<compile_context>
chip_gen: v7x
topology: tpu7x:2x2x1
jax: 0.10.0
libtpu: 0.0.40
codegen_flags: <defaults>
</compile_context>

<pallas_src>
import functools

import jax
import jax.numpy as jnp
from jax.experimental import pallas as pl
from jax.experimental.pallas import tpu as pltpu


# ----------------------------------------------------------------------------
# Pallas kernel: whole GUNET forward fused (eval mode, identity pooling)
# ----------------------------------------------------------------------------
def _gunet_fused_kernel(a_ref, xw0_ref, wd_ref, wum_ref, wux_ref, wfin_ref,
                        cin_ref, bs_ref, bfin_ref, o_ref, *, depth):
    """a:      [N,N]   bf16  normalized adjacency
       xw0:    [N,H]   bf16  x_in @ W_down0 (precomputed, K=4 kept out)
       wd:     [depth,H,H]     bf16  down convs 1..depth
       wum:    [depth-1,H,H]   bf16  up-conv weights hitting the skip tensor
       wux:    [depth-1,H,H]   bf16  up-conv weights hitting x
       wfin:   [2,H,128]       bf16  final conv split weights, lane-padded
       cin:    [N,128] f32   x_in @ W_final[x_in rows] (lane-padded)
       bs:     [2*depth,H] f32 biases: b_down0..b_down_depth, b_up0..b_up_{d-2}
       bfin:   [1,128] f32   final bias broadcast over lanes
       o:      [N,128] f32   sigmoid output; real result is column 0."""

    def mxu(p, q):
        # bf16 operands -> native MXU path; f32 accumulation.
        return jnp.dot(p.astype(jnp.bfloat16), q.astype(jnp.bfloat16),
                       preferred_element_type=jnp.float32)

    a = a_ref[...]                                            # [N, N] bf16

    # ---- down path: (A @ X) @ W ----
    # layer 0: feature transform X@W0 precomputed in the wrapper.
    x = jnp.maximum(mxu(a, xw0_ref[...]) + bs_ref[pl.ds(0, 1), :], 0.0)
    memory = [x.astype(jnp.bfloat16)]          # bf16 skip activations
    # TODO(synk): ClusterPooling (edge-score MLP + connected-component node
    # merging) is data-dependent graph coarsening with no clean dense Pallas
    # equivalent; modeled as identity pooling (unpool is identity).
    for i in range(1, depth):
        x = jnp.maximum(
            mxu(mxu(a, x), wd_ref[i - 1]) + bs_ref[pl.ds(i, 1), :], 0.0)
        memory.append(x.astype(jnp.bfloat16))

    # bottom conv (no activation)
    x = mxu(mxu(a, x), wd_ref[depth - 1]) + bs_ref[pl.ds(depth, 1), :]

    # ---- up path: A @ (X @ W), split-weight skips (no concatenation) ----
    for i in range(depth - 1):
        h = mxu(memory[depth - 1 - i], wum_ref[i]) + mxu(x, wux_ref[i])
        x = jnp.maximum(
            mxu(a, h) + bs_ref[pl.ds(depth + 1 + i, 1), :], 0.0)

    # final up conv: input order [memory[0] | x_in | x]; 1 real output channel
    # (weights zero-padded to 128 lanes -> dense unmasked stores).
    h = mxu(memory[0], wfin_ref[0]) + mxu(x, wfin_ref[1]) + cin_ref[...]
    y = mxu(a, h) + bfin_ref[...]
    o_ref[...] = pl.reciprocal(1.0 + jnp.exp(-y), approx=True)   # sigmoid


def gunet_forward(x, edge_index, params, depth=3):
    """Eval-mode GUNET forward (dropout disabled), fully fused in one kernel."""
    n, cin = x.shape
    hidden = params["down"][0][0].shape[1]
    lanes = 128
    f32, bf16 = jnp.float32, jnp.bfloat16

    a_hat = build_norm_adj(edge_index, n)

    # --- pack parameters into a handful of stacked arrays -------------------
    w0, b0 = params["down"][0]
    xw0 = x @ w0                                              # [N, H] f32
    wd = jnp.stack([params["down"][i][0] for i in range(1, depth + 1)])
    bstack = jnp.stack(
        [b0]
        + [params["down"][i][1] for i in range(1, depth + 1)]
        + [params["up"][i][1] for i in range(depth - 1)])     # [2*depth, H]
    wum = jnp.stack([params["up"][i][0][:hidden] for i in range(depth - 1)])
    wux = jnp.stack([params["up"][i][0][hidden:] for i in range(depth - 1)])
    wf, bfin_v = params["up"][depth - 1]                      # [2h+cin,1], [1]
    wfm = jnp.zeros((hidden, lanes), f32).at[:, :1].set(wf[:hidden])
    wfx = jnp.zeros((hidden, lanes), f32).at[:, :1].set(wf[hidden + cin:])
    wfin = jnp.stack([wfm, wfx])                              # [2, H, 128]
    wxin = jnp.zeros((cin, lanes), f32).at[:, :1].set(wf[hidden:hidden + cin])
    cinp = x @ wxin                                           # [N, 128] f32
    bfin = jnp.full((1, lanes), bfin_v[0], f32)

    args = [a_hat.astype(bf16), xw0.astype(bf16), wd.astype(bf16),
            wum.astype(bf16), wux.astype(bf16), wfin.astype(bf16),
            cinp.astype(f32), bstack.astype(f32), bfin]

    # --- VMEM budget: real footprint (args + live activations) + headroom ---
    arg_bytes = sum(int(v.size) * v.dtype.itemsize for v in args)
    act_bytes = (depth + 6) * n * max(hidden, lanes) * 4
    vmem_limit = int(min(max(2 * (arg_bytes + act_bytes), 16 << 20) + (4 << 20),
                         64 << 20))

    kernel = functools.partial(_gunet_fused_kernel, depth=depth)
    out = pl.pallas_call(
        kernel,
        out_shape=jax.ShapeDtypeStruct((n, lanes), f32),
        in_specs=[pl.BlockSpec(memory_space=pltpu.MemorySpace.VMEM)
                  for _ in args],
        out_specs=pl.BlockSpec(memory_space=pltpu.MemorySpace.VMEM),
        compiler_params=pltpu.CompilerParams(vmem_limit_bytes=vmem_limit),
    )(*args)
    return out[:, 0]                                          # .flatten()


# ----------------------------------------------------------------------------
# JAX glue: normalized adjacency, parameter init
# ----------------------------------------------------------------------------
def build_norm_adj(edge_index, num_nodes):
    """A_hat = D^{-1/2} (A + 2I) D^{-1/2}  (GCNConv improved=True)."""
    src = edge_index[:, 0]
    dst = edge_index[:, 1]
    a = jnp.zeros((num_nodes, num_nodes), jnp.float32)
    a = a.at[dst, src].add(1.0)               # messages flow src -> dst
    a = a + 2.0 * jnp.eye(num_nodes, dtype=jnp.float32)  # improved self loops
    deg = a.sum(axis=1)
    dinv = jnp.where(deg > 0, 1.0 / jnp.sqrt(deg), 0.0)
    return a * dinv[:, None] * dinv[None, :]


def glorot(key, cin, cout):
    lim = (6.0 / (cin + cout)) ** 0.5
    return jax.random.uniform(key, (cin, cout), jnp.float32, -lim, lim)


def init_params(key, in_channels, hidden, depth):
    params = {"down": [], "up": []}
    keys = jax.random.split(key, 2 * depth + 2)
    k = iter(keys)
    # down_convs: [in->h] + depth x [h->h]
    params["down"].append((glorot(next(k), in_channels, hidden),
                           jnp.zeros((hidden,), jnp.float32)))
    for _ in range(depth):
        params["down"].append((glorot(next(k), hidden, hidden),
                               jnp.zeros((hidden,), jnp.float32)))
    # up_convs: (depth-1) x [2h->h] + [2h+in -> 1]
    for _ in range(depth - 1):
        params["up"].append((glorot(next(k), 2 * hidden, hidden),
                             jnp.zeros((hidden,), jnp.float32)))
    params["up"].append((glorot(next(k), 2 * hidden + in_channels, 1),
                         jnp.zeros((1,), jnp.float32)))
    return params


# pure-JAX reference (same math, concat-based like the PyTorch module, f32)
def _ref_forward(x, edge_index, params, depth=3):
    n = x.shape[0]
    a_hat = build_norm_adj(edge_index, n)
    x_in = x
    memory = []
    for i in range(depth):
        w, b = params["down"][i]
        x = jnp.maximum(a_hat @ x @ w + b, 0.0)
        memory.append(x)
    memory[0] = jnp.concatenate([memory[0], x_in], axis=-1)
    w, b = params["down"][depth]
    x = a_hat @ x @ w + b
    for i in range(depth):
        x = jnp.concatenate([memory.pop(), x], axis=-1)
        w, b = params["up"][i]
        x = a_hat @ x @ w + b
        x = jnp.maximum(x, 0.0) if i < depth - 1 else jax.nn.sigmoid(x)
    return x.reshape(-1)


if __name__ == "__main__":
    N_NODES = 64
    IN_CHANNELS = 4
    HIDDEN = 128       # matches the module's default hidden_channels
    DEPTH = 3

    key = jax.random.PRNGKey(0)
    kx, kp = jax.random.split(key)

    # node features
    x = jax.random.normal(kx, (N_NODES, IN_CHANNELS), jnp.float32)
    # symmetric ring graph edge list [E, 2] (src, dst), like data[1]
    idx = jnp.arange(N_NODES)
    nxt = (idx + 1) % N_NODES
    edge_index = jnp.concatenate(
        [jnp.stack([idx, nxt], axis=1), jnp.stack([nxt, idx], axis=1)], axis=0
    ).astype(jnp.int32)

    params = init_params(kp, IN_CHANNELS, HIDDEN, DEPTH)

    out = gunet_forward(x, edge_index, params, depth=DEPTH)
    out = jax.block_until_ready(out)

    ref = _ref_forward(x, edge_index, params, depth=DEPTH)
    assert out.shape == (N_NODES,)
    # bf16 MXU operands across 7 fused layers -> relaxed (but meaningful,
    # outputs live in (0,1)) tolerance versus the f32 reference.
    assert jnp.allclose(out, ref, rtol=5e-2, atol=2e-2), \
        float(jnp.max(jnp.abs(out - ref)))

    print("KERNEL_OK")
</pallas_src>

<mosaic_0001>
module attributes {stable_mosaic.version = 11 : i64} {
  func.func @_gunet_fused_kernel(%arg0: memref<64x64xbf16, #tpu.memory_space<vmem>>, %arg1: memref<64x128xbf16, #tpu.memory_space<vmem>>, %arg2: memref<3x128x128xbf16, #tpu.memory_space<vmem>>, %arg3: memref<2x128x128xbf16, #tpu.memory_space<vmem>>, %arg4: memref<2x128x128xbf16, #tpu.memory_space<vmem>>, %arg5: memref<2x128x128xbf16, #tpu.memory_space<vmem>>, %arg6: memref<64x128xf32, #tpu.memory_space<vmem>>, %arg7: memref<6x128xf32, #tpu.memory_space<vmem>>, %arg8: memref<1x128xf32, #tpu.memory_space<vmem>>, %arg9: memref<64x128xf32, #tpu.memory_space<vmem>>) attributes {dimension_semantics = [], scalar_prefetch = 0 : i64, scratch_operands = 0 : i64, tpu.core_type = #tpu.core_type<tc>} {
    %c0 = arith.constant 0 : index
    %c0_0 = arith.constant 0 : index
    %0 = vector.load %arg0[%c0, %c0_0] : memref<64x64xbf16, #tpu.memory_space<vmem>>, vector<64x64xbf16>
    %c0_1 = arith.constant 0 : index
    %c0_2 = arith.constant 0 : index
    %1 = vector.load %arg1[%c0_1, %c0_2] : memref<64x128xbf16, #tpu.memory_space<vmem>>, vector<64x128xbf16>
    %cst = arith.constant dense<0.000000e+00> : vector<64x128xf32>
    %2 = tpu.matmul %0, %1, %cst {dimension_numbers = #tpu.dot_dimension_numbers<[1], [0], [0], [1], [0, 0, 1, 1], [], []>} : vector<64x64xbf16>, vector<64x128xbf16>, vector<64x128xf32> -> vector<64x128xf32>
    %c0_3 = arith.constant 0 : index
    %c0_4 = arith.constant 0 : index
    %3 = vector.load %arg7[%c0_3, %c0_4] : memref<6x128xf32, #tpu.memory_space<vmem>>, vector<1x128xf32>
    %4 = vector.broadcast %3 : vector<1x128xf32> to vector<64x128xf32>
    %5 = arith.addf %2, %4 : vector<64x128xf32>
    %cst_5 = arith.constant 0.000000e+00 : f32
    %6 = vector.broadcast %cst_5 : f32 to vector<64x128xf32>
    %7 = arith.maximumf %5, %6 : vector<64x128xf32>
    %8 = arith.truncf %7 : vector<64x128xf32> to vector<64x128xbf16>
    %9 = arith.truncf %7 : vector<64x128xf32> to vector<64x128xbf16>
    %cst_6 = arith.constant dense<0.000000e+00> : vector<64x128xf32>
    %10 = tpu.matmul %0, %9, %cst_6 {dimension_numbers = #tpu.dot_dimension_numbers<[1], [0], [0], [1], [0, 0, 1, 1], [], []>} : vector<64x64xbf16>, vector<64x128xbf16>, vector<64x128xf32> -> vector<64x128xf32>
    %c0_7 = arith.constant 0 : index
    %c0_8 = arith.constant 0 : index
    %c0_9 = arith.constant 0 : index
    %11 = vector.load %arg2[%c0_7, %c0_8, %c0_9] : memref<3x128x128xbf16, #tpu.memory_space<vmem>>, vector<1x128x128xbf16>
    %12 = vector.shape_cast %11 : vector<1x128x128xbf16> to vector<128x128xbf16>
    %13 = arith.truncf %10 : vector<64x128xf32> to vector<64x128xbf16>
    %cst_10 = arith.constant dense<0.000000e+00> : vector<64x128xf32>
    %14 = tpu.matmul %13, %12, %cst_10 {dimension_numbers = #tpu.dot_dimension_numbers<[1], [0], [0], [1], [0, 0, 1, 1], [], []>} : vector<64x128xbf16>, vector<128x128xbf16>, vector<64x128xf32> -> vector<64x128xf32>
    %c1 = arith.constant 1 : index
    %c0_11 = arith.constant 0 : index
    %15 = vector.load %arg7[%c1, %c0_11] : memref<6x128xf32, #tpu.memory_space<vmem>>, vector<1x128xf32>
    %16 = vector.broadcast %15 : vector<1x128xf32> to vector<64x128xf32>
    %17 = arith.addf %14, %16 : vector<64x128xf32>
    %cst_12 = arith.constant 0.000000e+00 : f32
    %18 = vector.broadcast %cst_12 : f32 to vector<64x128xf32>
    %19 = arith.maximumf %17, %18 : vector<64x128xf32>
    %20 = arith.truncf %19 : vector<64x128xf32> to vector<64x128xbf16>
    %21 = arith.truncf %19 : vector<64x128xf32> to vector<64x128xbf16>
    %cst_13 = arith.constant dense<0.000000e+00> : vector<64x128xf32>
    %22 = tpu.matmul %0, %21, %cst_13 {dimension_numbers = #tpu.dot_dimension_numbers<[1], [0], [0], [1], [0, 0, 1, 1], [], []>} : vector<64x64xbf16>, vector<64x128xbf16>, vector<64x128xf32> -> vector<64x128xf32>
    %c1_14 = arith.constant 1 : index
    %c0_15 = arith.constant 0 : index
    %c0_16 = arith.constant 0 : index
    %23 = vector.load %arg2[%c1_14, %c0_15, %c0_16] : memref<3x128x128xbf16, #tpu.memory_space<vmem>>, vector<1x128x128xbf16>
    %24 = vector.shape_cast %23 : vector<1x128x128xbf16> to vector<128x128xbf16>
    %25 = arith.truncf %22 : vector<64x128xf32> to vector<64x128xbf16>
    %cst_17 = arith.constant dense<0.000000e+00> : vector<64x128xf32>
    %26 = tpu.matmul %25, %24, %cst_17 {dimension_numbers = #tpu.dot_dimension_numbers<[1], [0], [0], [1], [0, 0, 1, 1], [], []>} : vector<64x128xbf16>, vector<128x128xbf16>, vector<64x128xf32> -> vector<64x128xf32>
    %c2 = arith.constant 2 : index
    %c0_18 = arith.constant 0 : index
    %27 = vector.load %arg7[%c2, %c0_18] : memref<6x128xf32, #tpu.memory_space<vmem>>, vector<1x128xf32>
    %28 = vector.broadcast %27 : vector<1x128xf32> to vector<64x128xf32>
    %29 = arith.addf %26, %28 : vector<64x128xf32>
    %cst_19 = arith.constant 0.000000e+00 : f32
    %30 = vector.broadcast %cst_19 : f32 to vector<64x128xf32>
    %31 = arith.maximumf %29, %30 : vector<64x128xf32>
    %32 = arith.truncf %31 : vector<64x128xf32> to vector<64x128xbf16>
    %33 = arith.truncf %31 : vector<64x128xf32> to vector<64x128xbf16>
    %cst_20 = arith.constant dense<0.000000e+00> : vector<64x128xf32>
    %34 = tpu.matmul %0, %33, %cst_20 {dimension_numbers = #tpu.dot_dimension_numbers<[1], [0], [0], [1], [0, 0, 1, 1], [], []>} : vector<64x64xbf16>, vector<64x128xbf16>, vector<64x128xf32> -> vector<64x128xf32>
    %c2_21 = arith.constant 2 : index
    %c0_22 = arith.constant 0 : index
    %c0_23 = arith.constant 0 : index
    %35 = vector.load %arg2[%c2_21, %c0_22, %c0_23] : memref<3x128x128xbf16, #tpu.memory_space<vmem>>, vector<1x128x128xbf16>
    %36 = vector.shape_cast %35 : vector<1x128x128xbf16> to vector<128x128xbf16>
    %37 = arith.truncf %34 : vector<64x128xf32> to vector<64x128xbf16>
    %cst_24 = arith.constant dense<0.000000e+00> : vector<64x128xf32>
    %38 = tpu.matmul %37, %36, %cst_24 {dimension_numbers = #tpu.dot_dimension_numbers<[1], [0], [0], [1], [0, 0, 1, 1], [], []>} : vector<64x128xbf16>, vector<128x128xbf16>, vector<64x128xf32> -> vector<64x128xf32>
    %c3 = arith.constant 3 : index
    %c0_25 = arith.constant 0 : index
    %39 = vector.load %arg7[%c3, %c0_25] : memref<6x128xf32, #tpu.memory_space<vmem>>, vector<1x128xf32>
    %40 = vector.broadcast %39 : vector<1x128xf32> to vector<64x128xf32>
    %41 = arith.addf %38, %40 : vector<64x128xf32>
    %c0_26 = arith.constant 0 : index
    %c0_27 = arith.constant 0 : index
    %c0_28 = arith.constant 0 : index
    %42 = vector.load %arg3[%c0_26, %c0_27, %c0_28] : memref<2x128x128xbf16, #tpu.memory_space<vmem>>, vector<1x128x128xbf16>
    %43 = vector.shape_cast %42 : vector<1x128x128xbf16> to vector<128x128xbf16>
    %cst_29 = arith.constant dense<0.000000e+00> : vector<64x128xf32>
    %44 = tpu.matmul %32, %43, %cst_29 {dimension_numbers = #tpu.dot_dimension_numbers<[1], [0], [0], [1], [0, 0, 1, 1], [], []>} : vector<64x128xbf16>, vector<128x128xbf16>, vector<64x128xf32> -> vector<64x128xf32>
    %c0_30 = arith.constant 0 : index
    %c0_31 = arith.constant 0 : index
    %c0_32 = arith.constant 0 : index
    %45 = vector.load %arg4[%c0_30, %c0_31, %c0_32] : memref<2x128x128xbf16, #tpu.memory_space<vmem>>, vector<1x128x128xbf16>
    %46 = vector.shape_cast %45 : vector<1x128x128xbf16> to vector<128x128xbf16>
    %47 = arith.truncf %41 : vector<64x128xf32> to vector<64x128xbf16>
    %cst_33 = arith.constant dense<0.000000e+00> : vector<64x128xf32>
    %48 = tpu.matmul %47, %46, %cst_33 {dimension_numbers = #tpu.dot_dimension_numbers<[1], [0], [0], [1], [0, 0, 1, 1], [], []>} : vector<64x128xbf16>, vector<128x128xbf16>, vector<64x128xf32> -> vector<64x128xf32>
    %49 = arith.addf %44, %48 : vector<64x128xf32>
    %50 = arith.truncf %49 : vector<64x128xf32> to vector<64x128xbf16>
    %cst_34 = arith.constant dense<0.000000e+00> : vector<64x128xf32>
    %51 = tpu.matmul %0, %50, %cst_34 {dimension_numbers = #tpu.dot_dimension_numbers<[1], [0], [0], [1], [0, 0, 1, 1], [], []>} : vector<64x64xbf16>, vector<64x128xbf16>, vector<64x128xf32> -> vector<64x128xf32>
    %c4 = arith.constant 4 : index
    %c0_35 = arith.constant 0 : index
    %52 = vector.load %arg7[%c4, %c0_35] : memref<6x128xf32, #tpu.memory_space<vmem>>, vector<1x128xf32>
    %53 = vector.broadcast %52 : vector<1x128xf32> to vector<64x128xf32>
    %54 = arith.addf %51, %53 : vector<64x128xf32>
    %cst_36 = arith.constant 0.000000e+00 : f32
    %55 = vector.broadcast %cst_36 : f32 to vector<64x128xf32>
    %56 = arith.maximumf %54, %55 : vector<64x128xf32>
    %c1_37 = arith.constant 1 : index
    %c0_38 = arith.constant 0 : index
    %c0_39 = arith.constant 0 : index
    %57 = vector.load %arg3[%c1_37, %c0_38, %c0_39] : memref<2x128x128xbf16, #tpu.memory_space<vmem>>, vector<1x128x128xbf16>
    %58 = vector.shape_cast %57 : vector<1x128x128xbf16> to vector<128x128xbf16>
    %cst_40 = arith.constant dense<0.000000e+00> : vector<64x128xf32>
    %59 = tpu.matmul %20, %58, %cst_40 {dimension_numbers = #tpu.dot_dimension_numbers<[1], [0], [0], [1], [0, 0, 1, 1], [], []>} : vector<64x128xbf16>, vector<128x128xbf16>, vector<64x128xf32> -> vector<64x128xf32>
    %c1_41 = arith.constant 1 : index
    %c0_42 = arith.constant 0 : index
    %c0_43 = arith.constant 0 : index
    %60 = vector.load %arg4[%c1_41, %c0_42, %c0_43] : memref<2x128x128xbf16, #tpu.memory_space<vmem>>, vector<1x128x128xbf16>
    %61 = vector.shape_cast %60 : vector<1x128x128xbf16> to vector<128x128xbf16>
    %62 = arith.truncf %56 : vector<64x128xf32> to vector<64x128xbf16>
    %cst_44 = arith.constant dense<0.000000e+00> : vector<64x128xf32>
    %63 = tpu.matmul %62, %61, %cst_44 {dimension_numbers = #tpu.dot_dimension_numbers<[1], [0], [0], [1], [0, 0, 1, 1], [], []>} : vector<64x128xbf16>, vector<128x128xbf16>, vector<64x128xf32> -> vector<64x128xf32>
    %64 = arith.addf %59, %63 : vector<64x128xf32>
    %65 = arith.truncf %64 : vector<64x128xf32> to vector<64x128xbf16>
    %cst_45 = arith.constant dense<0.000000e+00> : vector<64x128xf32>
    %66 = tpu.matmul %0, %65, %cst_45 {dimension_numbers = #tpu.dot_dimension_numbers<[1], [0], [0], [1], [0, 0, 1, 1], [], []>} : vector<64x64xbf16>, vector<64x128xbf16>, vector<64x128xf32> -> vector<64x128xf32>
    %c5 = arith.constant 5 : index
    %c0_46 = arith.constant 0 : index
    %67 = vector.load %arg7[%c5, %c0_46] : memref<6x128xf32, #tpu.memory_space<vmem>>, vector<1x128xf32>
    %68 = vector.broadcast %67 : vector<1x128xf32> to vector<64x128xf32>
    %69 = arith.addf %66, %68 : vector<64x128xf32>
    %cst_47 = arith.constant 0.000000e+00 : f32
    %70 = vector.broadcast %cst_47 : f32 to vector<64x128xf32>
    %71 = arith.maximumf %69, %70 : vector<64x128xf32>
    %c0_48 = arith.constant 0 : index
    %c0_49 = arith.constant 0 : index
    %c0_50 = arith.constant 0 : index
    %72 = vector.load %arg5[%c0_48, %c0_49, %c0_50] : memref<2x128x128xbf16, #tpu.memory_space<vmem>>, vector<1x128x128xbf16>
    %73 = vector.shape_cast %72 : vector<1x128x128xbf16> to vector<128x128xbf16>
    %cst_51 = arith.constant dense<0.000000e+00> : vector<64x128xf32>
    %74 = tpu.matmul %8, %73, %cst_51 {dimension_numbers = #tpu.dot_dimension_numbers<[1], [0], [0], [1], [0, 0, 1, 1], [], []>} : vector<64x128xbf16>, vector<128x128xbf16>, vector<64x128xf32> -> vector<64x128xf32>
    %c1_52 = arith.constant 1 : index
    %c0_53 = arith.constant 0 : index
    %c0_54 = arith.constant 0 : index
    %75 = vector.load %arg5[%c1_52, %c0_53, %c0_54] : memref<2x128x128xbf16, #tpu.memory_space<vmem>>, vector<1x128x128xbf16>
    %76 = vector.shape_cast %75 : vector<1x128x128xbf16> to vector<128x128xbf16>
    %77 = arith.truncf %71 : vector<64x128xf32> to vector<64x128xbf16>
    %cst_55 = arith.constant dense<0.000000e+00> : vector<64x128xf32>
    %78 = tpu.matmul %77, %76, %cst_55 {dimension_numbers = #tpu.dot_dimension_numbers<[1], [0], [0], [1], [0, 0, 1, 1], [], []>} : vector<64x128xbf16>, vector<128x128xbf16>, vector<64x128xf32> -> vector<64x128xf32>
    %79 = arith.addf %74, %78 : vector<64x128xf32>
    %c0_56 = arith.constant 0 : index
    %c0_57 = arith.constant 0 : index
    %80 = vector.load %arg6[%c0_56, %c0_57] : memref<64x128xf32, #tpu.memory_space<vmem>>, vector<64x128xf32>
    %81 = arith.addf %79, %80 : vector<64x128xf32>
    %82 = arith.truncf %81 : vector<64x128xf32> to vector<64x128xbf16>
    %cst_58 = arith.constant dense<0.000000e+00> : vector<64x128xf32>
    %83 = tpu.matmul %0, %82, %cst_58 {dimension_numbers = #tpu.dot_dimension_numbers<[1], [0], [0], [1], [0, 0, 1, 1], [], []>} : vector<64x64xbf16>, vector<64x128xbf16>, vector<64x128xf32> -> vector<64x128xf32>
    %c0_59 = arith.constant 0 : index
    %c0_60 = arith.constant 0 : index
    %84 = vector.load %arg8[%c0_59, %c0_60] : memref<1x128xf32, #tpu.memory_space<vmem>>, vector<1x128xf32>
    %85 = vector.broadcast %84 : vector<1x128xf32> to vector<64x128xf32>
    %86 = arith.addf %83, %85 : vector<64x128xf32>
    %cst_61 = arith.constant 0.000000e+00 : f32
    %87 = vector.broadcast %cst_61 : f32 to vector<64x128xf32>
    %88 = arith.subf %87, %86 : vector<64x128xf32>
    %89 = math.exp %88 : vector<64x128xf32>
    %cst_62 = arith.constant 1.000000e+00 : f32
    %90 = vector.broadcast %cst_62 : f32 to vector<64x128xf32>
    %91 = arith.addf %90, %89 : vector<64x128xf32>
    %92 = tpu.reciprocal %91 {approx = true} : vector<64x128xf32> -> vector<64x128xf32>
    %c0_63 = arith.constant 0 : index
    %c0_64 = arith.constant 0 : index
    %93 = vector.load %arg9[%c0_63, %c0_64] : memref<64x128xf32, #tpu.memory_space<vmem>>, vector<64x128xf32>
    tpu.vector_store %arg9[%c0_63, %c0_64], %92 {strides = array<i32>} : memref<64x128xf32, #tpu.memory_space<vmem>>, vector<64x128xf32>,
    return
  }
}

</mosaic_0001>

<bundles_post_ra>
// kernel: tpu_custom_call.1
= control target key start
LH: loop header
LB: loop body
LE: loop exit
PB: predicated region body
PF: predicated region fallthrough
CT: control target
= control target key end

     0   :  { %14 = vsyncpa [#allocation3], 0  ;;  %s3330_s0 = inlined_call_operand.hbm [shape: bf16[64,64], index: 0, kind: input, shape index: {}]   ;;  %s3331_s1 = inlined_call_operand.hbm [shape: bf16[64,128], index: 1, kind: input, shape index: {}]   ;;  %s3332_s2 = inlined_call_operand.hbm [shape: bf16[3,128,128], index: 2, kind: input, shape index: {}]   ;;  %s3333_s3 = inlined_call_operand.hbm [shape: bf16[2,128,128], index: 3, kind: input, shape index: {}]   ;;  %s3334_s4 = inlined_call_operand.hbm [shape: bf16[2,128,128], index: 4, kind: input, shape index: {}]   ;;  %s3335_s5 = inlined_call_operand.hbm [shape: bf16[2,128,128], index: 5, kind: input, shape index: {}]   ;;  %s3336_s6 = inlined_call_operand.hbm [shape: f32[64,128], index: 6, kind: input, shape index: {}]   ;;  %s3337_s7 = inlined_call_operand.vmem [shape: f32[6,128], index: 7, kind: input, shape index: {}]   ;;  %s3338_s8 = inlined_call_operand.vmem [shape: f32[1,128], index: 8, kind: input, shape index: {}]   ;;  %s3339_s9 = inlined_call_operand.hbm [shape: f32[64,128], index: 9, kind: output, shape index: {}]  }
   0x1   :  { %15 = vsyncpa [#allocation6], 0 }
   0x2   :  { %16 = vsyncpa [#allocation9], 0 }
   0x3   :  { %17 = vsyncpa [#allocation12], 0 }
   0x4   :  { %18 = vsyncpa [#allocation4], 0  ;;  %s2977_s30 = smov [#allocation5]   ;;  %s2978_s11 = smov [#allocation8]  }
   0x5   :  { %s36_s10 = sshll.u32 %s2977_s30, 4  ;;  %s60_s12 = sshll.u32 %s2978_s11, 4  ;;  %s37_s10 = int_to_ptr.vmem [resolvable:$true] %s36_s10  ;;  %s3039_s12 = int_to_ptr.vmem [resolvable:$true] %s60_s12 }
   0x6   :  { %s2791_s15 = scalar_lea.hbm %s3331_s1, 512 }
   0x7   :  { %p2792_p0 = scmp.ne.s32.totalorder %s3331_s1, %s2791_s15  ;;  %p2795_p1 = scmp.lt.u32.totalorder %s2791_s15, %s3331_s1 }
   0x9   :  { %p2797_p2 = pnand %p2795_p1, %p2792_p0 }
   0xb   :  { %2800 = shalt.err (!%p2797_p2)
}
   0xc   :  { %s2801_s20 = scalar_lea.vmem %s37_s10, 512  ;;  %p2806_p4 = scmp.lt.s32.totalorder %s37_s10, %s37_s10 }
   0xd   :  { %p2802_p3 = scmp.ne.s32.totalorder %s37_s10, %s2801_s20  ;;  %p2807_p5 = scmp.lt.s32.totalorder %s2801_s20, %s2801_s20 }
   0xf   :  { %p2808_p6 = por %p2807_p5, %p2806_p4 }
  0x11   :  { %p2809_p7 = pnand %p2808_p6, %p2802_p3 }
  0x13   :  { %2812 = shalt.err (!%p2809_p7)
}
  0x14   :  { %s2979_s21 = smov 64   ;;  %s2980_s22 = smov 4  }
  0x15   :  { %42 = dma.hbm_to_vmem [thread:$0]  %s3331_s1, 512, %s37_s10, [#allocation6], %s2979_s21, %s2979_s21, %s2980_s22  }
  0x16   :  { %s2813_s27 = scalar_lea.hbm %s3333_s3, 2048 }
  0x17   :  { %p2814_p8 = scmp.ne.s32.totalorder %s3333_s3, %s2813_s27  ;;  %p2817_p9 = scmp.lt.u32.totalorder %s2813_s27, %s3333_s3 }
  0x19   :  { %p2819_p10 = pnand %p2817_p9, %p2814_p8 }
  0x1b   :  { %2822 = shalt.err (!%p2819_p10)
}
  0x1c   :  { %s2823_s13 = scalar_lea.vmem %s3039_s12, 2048  ;;  %p2828_p12 = scmp.lt.s32.totalorder %s3039_s12, %s3039_s12 }
  0x1d   :  { %p2824_p11 = scmp.ne.s32.totalorder %s3039_s12, %s2823_s13  ;;  %p2829_p13 = scmp.lt.s32.totalorder %s2823_s13, %s2823_s13 }
  0x1f   :  { %p2830_p0 = por %p2829_p13, %p2828_p12 }
  0x21   :  { %p2831_p1 = pnand %p2830_p0, %p2824_p11 }
  0x23   :  { %2834 = shalt.err (!%p2831_p1)
}
  0x24   :  { %66 = dma.hbm_to_vmem [thread:$0]  %s3333_s3, 2048, %s3039_s12, [#allocation9], %s2979_s21, %s2979_s21, %s2980_s22  }
  0x25   :  { %s2981_s14 = smov [#allocation11]   ;;  %s2982_s16 = smov [#allocation2]  }
  0x26   :  { %s84_s15 = sshll.u32 %s2981_s14, 4  ;;  %s24_s17 = sshll.u32 %s2982_s16, 4  ;;  %s85_s15 = int_to_ptr.vmem [resolvable:$true] %s84_s15  ;;  %s3076_s17 = int_to_ptr.vmem [resolvable:$true] %s24_s17 }
  0x27   :  { %s2835_s20 = scalar_lea.hbm %s3335_s5, 2048 }
  0x28   :  { %p2836_p2 = scmp.ne.s32.totalorder %s3335_s5, %s2835_s20  ;;  %p2839_p3 = scmp.lt.u32.totalorder %s2835_s20, %s3335_s5 }
  0x2a   :  { %p2841_p4 = pnand %p2839_p3, %p2836_p2 }
  0x2c   :  { %2844 = shalt.err (!%p2841_p4)
}
  0x2d   :  { %s2845_s3 = scalar_lea.vmem %s85_s15, 2048  ;;  %p2850_p6 = scmp.lt.s32.totalorder %s85_s15, %s85_s15 }
  0x2e   :  { %p2846_p5 = scmp.ne.s32.totalorder %s85_s15, %s2845_s3  ;;  %p2851_p7 = scmp.lt.s32.totalorder %s2845_s3, %s2845_s3 }
  0x30   :  { %p2852_p8 = por %p2851_p7, %p2850_p6 }
  0x32   :  { %p2853_p9 = pnand %p2852_p8, %p2846_p5 }
  0x34   :  { %2856 = shalt.err (!%p2853_p9)
}
  0x35   :  { %90 = dma.hbm_to_vmem [thread:$0]  %s3335_s5, 2048, %s85_s15, [#allocation12], %s2979_s21, %s2979_s21, %s2980_s22  }
  0x36   :  { %s2857_s30 = scalar_lea.hbm %s3330_s0, 512 }
  0x37   :  { %p2858_p10 = scmp.ne.s32.totalorder %s3330_s0, %s2857_s30  ;;  %p2861_p11 = scmp.lt.u32.totalorder %s2857_s30, %s3330_s0 }
  0x39   :  { %p2863_p12 = pnand %p2861_p11, %p2858_p10 }
  0x3b   :  { %2866 = shalt.err (!%p2863_p12)
}
  0x3c   :  { %s2867_s14 = scalar_lea.vmem %s3076_s17, 512  ;;  %p2872_p0 = scmp.lt.s32.totalorder %s3076_s17, %s3076_s17 }
  0x3d   :  { %p2868_p13 = scmp.ne.s32.totalorder %s3076_s17, %s2867_s14  ;;  %p2873_p1 = scmp.lt.s32.totalorder %s2867_s14, %s2867_s14 }
  0x3f   :  { %p2874_p2 = por %p2873_p1, %p2872_p0 }
  0x41   :  { %p2875_p3 = pnand %p2874_p2, %p2868_p13 }
  0x43   :  { %2878 = shalt.err (!%p2875_p3)
}
  0x44   :  { %30 = dma.hbm_to_vmem [thread:$0]  %s3330_s0, 512, %s3076_s17, [#allocation3], %s2979_s21, %s2979_s21, %s2980_s22  }
  0x45   :  { %s2983_s16 = smov [#allocation7]   ;;  %s2984_s19 = smov [#allocation10]  }
  0x46   :  { %s48_s18 = sshll.u32 %s2983_s16, 4  ;;  %s72_s20 = sshll.u32 %s2984_s19, 4  ;;  %s49_s18 = int_to_ptr.vmem [resolvable:$true] %s48_s18  ;;  %s3113_s20 = int_to_ptr.vmem [resolvable:$true] %s72_s20 }
  0x47   :  { %s2879_s25 = scalar_lea.hbm %s3332_s2, 3072 }
  0x48   :  { %p2880_p4 = scmp.ne.s32.totalorder %s3332_s2, %s2879_s25  ;;  %p2883_p5 = scmp.lt.u32.totalorder %s2879_s25, %s3332_s2 }
  0x4a   :  { %p2885_p6 = pnand %p2883_p5, %p2880_p4 }
  0x4c   :  { %2888 = shalt.err (!%p2885_p6)
}
  0x4d   :  { %s2889_s0 = scalar_lea.vmem %s49_s18, 3072  ;;  %p2894_p8 = scmp.lt.s32.totalorder %s49_s18, %s49_s18 }
  0x4e   :  { %p2890_p7 = scmp.ne.s32.totalorder %s49_s18, %s2889_s0  ;;  %p2895_p9 = scmp.lt.s32.totalorder %s2889_s0, %s2889_s0 }
  0x50   :  { %p2896_p10 = por %p2895_p9, %p2894_p8 }
  0x52   :  { %p2897_p11 = pnand %p2896_p10, %p2890_p7 }
  0x54   :  { %2900 = shalt.err (!%p2897_p11)
}
  0x55   :  { %54 = dma.hbm_to_vmem [thread:$0]  %s3332_s2, 3072, %s49_s18, [#allocation6], %s2979_s21, %s2979_s21, %s2980_s22  }
  0x56   :  { %s2901_s11 = scalar_lea.hbm %s3334_s4, 2048 }
  0x57   :  { %p2902_p12 = scmp.ne.s32.totalorder %s3334_s4, %s2901_s11  ;;  %p2905_p13 = scmp.lt.u32.totalorder %s2901_s11, %s3334_s4 }
  0x59   :  { %p2907_p0 = pnand %p2905_p13, %p2902_p12 }
  0x5b   :  { %2910 = shalt.err (!%p2907_p0)
}
  0x5c   :  { %s2911_s5 = scalar_lea.vmem %s3113_s20, 2048  ;;  %p2916_p2 = scmp.lt.s32.totalorder %s3113_s20, %s3113_s20 }
  0x5d   :  { %p2912_p1 = scmp.ne.s32.totalorder %s3113_s20, %s2911_s5  ;;  %p2917_p3 = scmp.lt.s32.totalorder %s2911_s5, %s2911_s5 }
  0x5f   :  { %p2918_p4 = por %p2917_p3, %p2916_p2 }
  0x61   :  { %p2919_p5 = pnand %p2918_p4, %p2912_p1 }
  0x63   :  { %2922 = shalt.err (!%p2919_p5)
}
  0x64   :  { %78 = dma.hbm_to_vmem [thread:$0]  %s3334_s4, 2048, %s3113_s20, [#allocation9], %s2979_s21, %s2979_s21, %s2980_s22  }
  0x65   :  { %s2985_s16 = smov [#allocation13]   ;;  %s2923_s24 = scalar_lea.hbm %s3336_s6, 1024 }
  0x66   :  { %s96_s18 = sshll.u32 %s2985_s16, 4  ;;  %p2924_p6 = scmp.ne.s32.totalorder %s3336_s6, %s2923_s24  ;;  %s97_s18 = int_to_ptr.vmem [resolvable:$true] %s96_s18 }
  0x67   :  { %p2927_p7 = scmp.lt.u32.totalorder %s2923_s24, %s3336_s6 }
  0x69   :  { %p2929_p8 = pnand %p2927_p7, %p2924_p6 }
  0x6b   :  { %2932 = shalt.err (!%p2929_p8)
}
  0x6c   :  { %s2933_s27 = scalar_lea.vmem %s97_s18, 1024  ;;  %p2938_p10 = scmp.lt.s32.totalorder %s97_s18, %s97_s18 }
  0x6d   :  { %p2934_p9 = scmp.ne.s32.totalorder %s97_s18, %s2933_s27  ;;  %p2939_p11 = scmp.lt.s32.totalorder %s2933_s27, %s2933_s27 }
  0x6f   :  { %p2940_p12 = por %p2939_p11, %p2938_p10 }
  0x71   :  { %p2941_p13 = pnand %p2940_p12, %p2934_p9 }
  0x73   :  { %2944 = shalt.err (!%p2941_p13)
}
  0x74   :  { %s2986_s4 = smov 128   ;;  %s2987_s21 = smov 8  }
  0x75   :  { %102 = dma.hbm_to_vmem [thread:$0]  %s3336_s6, 1024, %s97_s18, [#allocation12], %s2986_s4, %s2986_s4, %s2987_s21  }
  0x76   :  { %2967 = dma.done.wait [#allocation3], 512  }
  0x77   :  { %2968 = vsyncadd [#allocation3], 4294966784 }
  0x78   :  { %2969 = dma.done.wait [#allocation6], 3584  }
  0x79   :  { %2970 = vsyncadd [#allocation6], 4294963712 }
  0x7a   :  { %2971 = dma.done.wait [#allocation9], 4096  }
  0x7b   :  { %2972 = vsyncadd [#allocation9], 4294963200 }
  0x7c   :  { %2973 = dma.done.wait [#allocation12], 3072  }
  0x7d   :  { %2974 = vsyncadd [#allocation12], 4294964224  ;;  %v2675_v0 = vld [vmem:[#allocation5] sm:$0xff]   ;;  %v2676_v1 = vld [vmem:[#allocation5 + $0x8] sm:$0xff]   ;;  %vm194_vm0 = vcmask 523264  }
  0x7e   :  { %2311 = vmatprep.subr.bf16.mxu0 %v2675_v0  ;;  %v2677_v2 = vld [vmem:[#allocation5 + $0x10] sm:$0xff]   ;;  %v3165_v3 = vld [vmem:[#allocation2] sm:$0xff]   ;;  %v2678_v4 = vld [vmem:[#allocation5 + $0x18] sm:$0xff]  }
  0x7f   :  { %2312 = vmatpush3.bf16.msra.mxu0 %v2675_v0  ;;  %2319 = vmatprep.mubr.msk.bf16.mxu0 %vm194_vm0, %v3165_v3  ;;  %v3171_v5 = vld [vmem:[#allocation2 + $0x8] sm:$0xff]   ;;  %v3173_v6 = vld [vmem:[#allocation2 + $0x10] sm:$0xff]   ;;  %v3179_v7 = vld [vmem:[#allocation2 + $0x18] sm:$0xff]  }
  0x80   :  { %2313 = vmatprep.subr.bf16.mxu0 %v2676_v1  ;;  %2335 = vmatprep.mubr.msk.bf16.mxu1 %vm194_vm0, %v3165_v3  ;;  %v2683_v8 = vld [vmem:[#allocation7] sm:$0xff]   ;;  %v2684_v9 = vld [vmem:[#allocation7 + $0x8] sm:$0xff]   ;;  %v2685_v10 = vld [vmem:[#allocation7 + $0x10] sm:$0xff]  }
  0x81   :  { %v2686_v11 = vld [vmem:[#allocation7 + $0x18] sm:$0xff]   ;;  %v2687_v12 = vld [vmem:[#allocation7 + $0x20] sm:$0xff]   ;;  %v2688_v13 = vld [vmem:[#allocation7 + $0x28] sm:$0xff]  }
  0x82   :  { %v2689_v14 = vld [vmem:[#allocation7 + $0x30] sm:$0xff]   ;;  %v2032_v15 = vld [vmem:[%s3337_s7] ss:$0 sm:$0xff]  ;;  %v2690_v44 = vld [vmem:[#allocation7 + $0x38] sm:$0xff]  }
  0x83   :  { %2314 = vmatpush3.bf16.msra.mxu0 %v2676_v1  ;;  %v2049_v57 = vld [vmem:[%s3337_s7 + $0x1] ss:$0 sm:$0xff] }
  0x84   :  { %2315 = vmatprep.subr.bf16.mxu0 %v2677_v2 }
  0x87   :  { %2316 = vmatpush3.bf16.msra.mxu0 %v2677_v2 }
  0x88   :  { %2317 = vmatprep.subr.bf16.mxu0 %v2678_v4 }
  0x8b   :  { %2318 = vmatpush3.bf16.msra.mxu0 %v2678_v4 }
  0x8c   :  { %2343 = vmatprep.subr.bf16.mxu0 %v2683_v8 }
  0x8e   :  { %2320 = vmatmul.mubr.msk.bf16.vlgmr.msra.gmra.mrb[0].mxu0 %vm194_vm0, %v3171_v5 }
  0x8f   :  { %2323 = vmatprep.mubr.msk.bf16.mxu0 %vm194_vm0, %v3173_v6  ;;  %2344 = vmatpush3.bf16.msra.mxu0 %v2683_v8 }
  0x90   :  { %2345 = vmatprep.subr.bf16.mxu0 %v2684_v9 }
  0x93   :  { %2346 = vmatpush3.bf16.msra.mxu0 %v2684_v9 }
  0x94   :  { %2347 = vmatprep.subr.bf16.mxu0 %v2685_v10 }
  0x96   :  { %2324 = vmatmul.mubr.msk.bf16.gmra.mrb[4].mxu0 %vm194_vm0, %v3179_v7 }
  0x97   :  { %2348 = vmatpush3.bf16.msra.mxu0 %v2685_v10 }
  0x98   :  { %2349 = vmatprep.subr.bf16.mxu0 %v2686_v11 }
  0x9b   :  { %2350 = vmatpush3.bf16.msra.mxu0 %v2686_v11 }
  0x9c   :  { %2351 = vmatprep.subr.bf16.mxu0 %v2687_v12 }
  0x9f   :  { %2352 = vmatpush3.bf16.msra.mxu0 %v2687_v12 }
  0xa0   :  { %2353 = vmatprep.subr.bf16.mxu0 %v2688_v13 }
  0xa3   :  { %2354 = vmatpush3.bf16.msra.mxu0 %v2688_v13 }
  0xa4   :  { %2355 = vmatprep.subr.bf16.mxu0 %v2689_v14 }
  0xa7   :  { %2356 = vmatpush3.bf16.msra.mxu0 %v2689_v14 }
  0xa8   :  { %2357 = vmatprep.subr.bf16.mxu0 %v2690_v44 }
  0xab   :  { %2358 = vmatpush3.bf16.msra.mxu0 %v2690_v44 }
 0x161   :  { %v2321_v16 = vpop.f32.mrb[0].mxu0 }
 0x162   :  { %v250_v17 = vadd.f32 %v2321_v16, %v2032_v15  ;;  %v241_v18 = vpop.f32.mrb[1].mxu0 }
 0x163   :  { %v242_v19 = vadd.f32 %v2032_v15, %v241_v18  ;;  %v2322_v20 = vpop.f32.mrb[2].mxu0 }
 0x164   :  { %v253_v21 = vadd.f32 %v2322_v20, %v2032_v15  ;;  %v244_v22 = vpop.f32.mrb[3].mxu0  ;;  %v274_v24 = vmax.f32 %v250_v17, 0.0 }
 0x165   :  { %v245_v23 = vadd.f32 %v2032_v15, %v244_v22  ;;  %v272_v26 = vmax.f32 %v242_v19, 0.0 }
 0x166   :  { %v275_v25 = vmax.f32 %v253_v21, 0.0 }
 0x167   :  { %v273_v27 = vmax.f32 %v245_v23, 0.0 }
 0x168   :  { %v3186_v28 = vpack.c.bf16 %v275_v25, %v274_v24 }
 0x169   :  { %v3188_v29 = vpack.c.bf16 %v273_v27, %v272_v26  ;;  %v2325_v30 = vpop.f32.mrb[4].mxu0  ;;  %v2691_v26 = vld [vmem:[#allocation7 + $0x40] sm:$0xff]   ;;  %v2692_v27 = vld [vmem:[#allocation7 + $0x48] sm:$0xff]  }
 0x16a   :  { %v266_v31 = vadd.f32 %v2325_v30, %v2032_v15  ;;  %v257_v32 = vpop.f32.mrb[5].mxu0  ;;  %v2693_v30 = vld [vmem:[#allocation7 + $0x50] sm:$0xff]  }
 0x16b   :  { %v258_v33 = vadd.f32 %v2032_v15, %v257_v32  ;;  %v2326_v34 = vpop.f32.mrb[6].mxu0  ;;  %2327 = vmatprep.subr.bf16.mxu1 %v3188_v29  ;;  %v2695_v32 = vld [vmem:[#allocation7 + $0x60] sm:$0xff]  }
 0x16c   :  { %v269_v35 = vadd.f32 %v2326_v34, %v2032_v15  ;;  %v260_v36 = vpop.f32.mrb[7].mxu0  ;;  %2328 = vmatpush3.bf16.msra.mxu1 %v3188_v29  ;;  %v278_v38 = vmax.f32 %v266_v31, 0.0  ;;  %v2694_v31 = vld [vmem:[#allocation7 + $0x58] sm:$0xff]   ;;  %v2697_v34 = vld [vmem:[#allocation7 + $0x70] sm:$0xff]  }
 0x16d   :  { %v261_v37 = vadd.f32 %v2032_v15, %v260_v36  ;;  %2329 = vmatprep.subr.bf16.mxu1 %v3186_v28  ;;  %v276_v40 = vmax.f32 %v258_v33, 0.0  ;;  %v2696_v33 = vld [vmem:[#allocation7 + $0x68] sm:$0xff]  }
 0x16e   :  { %v279_v39 = vmax.f32 %v269_v35, 0.0  ;;  %v2698_v35 = vld [vmem:[#allocation7 + $0x78] sm:$0xff]  }
 0x16f   :  { %v277_v41 = vmax.f32 %v261_v37, 0.0 }
 0x170   :  { %v3193_v42 = vpack.c.bf16 %v279_v39, %v278_v38  ;;  %2330 = vmatpush3.bf16.msra.mxu1 %v3186_v28 }
 0x171   :  { %v3196_v43 = vpack.c.bf16 %v277_v41, %v276_v40 }
 0x173   :  { %2331 = vmatprep.subr.bf16.mxu1 %v3196_v43 }
 0x174   :  { %2332 = vmatpush3.bf16.msra.mxu1 %v3196_v43 }
 0x175   :  { %2333 = vmatprep.subr.bf16.mxu1 %v3193_v42 }
 0x178   :  { %2334 = vmatpush3.bf16.msra.mxu1 %v3193_v42 }
 0x17b   :  { %2336 = vmatmul.mubr.msk.bf16.vlgmr.msra.gmra.mrb[0].mxu1 %vm194_vm0, %v3171_v5 }
 0x17c   :  { %2339 = vmatprep.mubr.msk.bf16.mxu1 %vm194_vm0, %v3173_v6 }
 0x183   :  { %2340 = vmatmul.mubr.msk.bf16.gmra.mrb[4].mxu1 %vm194_vm0, %v3179_v7 }
 0x184   :  { %2375 = vmatprep.mubr.msk.bf16.mxu1 %vm194_vm0, %v3165_v3 }
 0x24e   :  { %v2337_v45 = vpop.f32.mrb[0].mxu1 }
 0x24f   :  { %v318_v46 = vpop.f32.mrb[1].mxu1 }
 0x250   :  { %v2338_v47 = vpop.f32.mrb[2].mxu1 }
 0x251   :  { %v366_v48 = vpack.c.bf16 %v2338_v47, %v2337_v45  ;;  %v321_v49 = vpop.f32.mrb[3].mxu1 }
 0x252   :  { %v365_v50 = vpack.c.bf16 %v321_v49, %v318_v46 }
 0x254   :  { %2359 = vmatprep.mubr.bf16.mxu0 %v365_v50  ;;  %v2062_v50 = vld [vmem:[%s3337_s7 + $0x2] ss:$0 sm:$0xff] }
 0x255   :  { %2360 = vmatmul.mubr.bf16.vlgmr.msra.gmra.mrb[8].mxu0 %v366_v48 }
 0x256   :  { %v2341_v51 = vpop.f32.mrb[4].mxu1 }
 0x257   :  { %v334_v52 = vpop.f32.mrb[5].mxu1 }
 0x258   :  { %v2342_v53 = vpop.f32.mrb[6].mxu1 }
 0x259   :  { %v368_v54 = vpack.c.bf16 %v2342_v53, %v2341_v51  ;;  %v337_v55 = vpop.f32.mrb[7].mxu1 }
 0x25a   :  { %v367_v56 = vpack.c.bf16 %v337_v55, %v334_v52 }
 0x25c   :  { %2363 = vmatprep.mubr.bf16.mxu0 %v367_v56 }
 0x25d   :  { %2364 = vmatmul.mubr.bf16.gmra.mrb[12].mxu0 %v368_v54 }
 0x25e   :  { %2415 = vmatprep.mubr.msk.bf16.mxu0 %vm194_vm0, %v3165_v3 }
 0x328   :  { %v2361_v58 = vpop.f32.mrb[8].mxu0 }
 0x329   :  { %v465_v59 = vadd.f32 %v2361_v58, %v2049_v57  ;;  %v456_v60 = vpop.f32.mrb[9].mxu0 }
 0x32a   :  { %v457_v61 = vadd.f32 %v2049_v57, %v456_v60  ;;  %v2362_v62 = vpop.f32.mrb[10].mxu0 }
 0x32b   :  { %v468_v63 = vadd.f32 %v2362_v62, %v2049_v57  ;;  %v459_v0 = vpop.f32.mrb[11].mxu0  ;;  %v489_v2 = vmax.f32 %v465_v59, 0.0 }
 0x32c   :  { %v460_v1 = vadd.f32 %v2049_v57, %v459_v0  ;;  %v487_v8 = vmax.f32 %v457_v61, 0.0 }
 0x32d   :  { %v490_v4 = vmax.f32 %v468_v63, 0.0 }
 0x32e   :  { %v488_v9 = vmax.f32 %v460_v1, 0.0 }
 0x32f   :  { %v3215_v10 = vpack.c.bf16 %v490_v4, %v489_v2 }
 0x330   :  { %v3217_v11 = vpack.c.bf16 %v488_v9, %v487_v8  ;;  %v2365_v12 = vpop.f32.mrb[12].mxu0 }
 0x331   :  { %v481_v13 = vadd.f32 %v2365_v12, %v2049_v57  ;;  %v472_v14 = vpop.f32.mrb[13].mxu0 }
 0x332   :  { %v473_v15 = vadd.f32 %v2049_v57, %v472_v14  ;;  %v2366_v16 = vpop.f32.mrb[14].mxu0  ;;  %2367 = vmatprep.subr.bf16.mxu1 %v3217_v11 }
 0x333   :  { %v484_v17 = vadd.f32 %v2366_v16, %v2049_v57  ;;  %v475_v18 = vpop.f32.mrb[15].mxu0  ;;  %2368 = vmatpush3.bf16.msra.mxu1 %v3217_v11  ;;  %v493_v20 = vmax.f32 %v481_v13, 0.0 }
 0x334   :  { %v476_v19 = vadd.f32 %v2049_v57, %v475_v18  ;;  %2369 = vmatprep.subr.bf16.mxu1 %v3215_v10  ;;  %v491_v22 = vmax.f32 %v473_v15, 0.0 }
 0x335   :  { %v494_v21 = vmax.f32 %v484_v17, 0.0 }
 0x336   :  { %v492_v23 = vmax.f32 %v476_v19, 0.0 }
 0x337   :  { %v3222_v24 = vpack.c.bf16 %v494_v21, %v493_v20  ;;  %2370 = vmatpush3.bf16.msra.mxu1 %v3215_v10  ;;  %v2699_v21 = vld [vmem:[#allocation7 + $0x80] sm:$0xff]  }
 0x338   :  { %v3225_v25 = vpack.c.bf16 %v492_v23, %v491_v22  ;;  %v2700_v22 = vld [vmem:[#allocation7 + $0x88] sm:$0xff]   ;;  %v2701_v23 = vld [vmem:[#allocation7 + $0x90] sm:$0xff]  }
 0x33a   :  { %2371 = vmatprep.subr.bf16.mxu1 %v3225_v25 }
 0x33b   :  { %2372 = vmatpush3.bf16.msra.mxu1 %v3225_v25 }
 0x33c   :  { %2373 = vmatprep.subr.bf16.mxu1 %v3222_v24 }
 0x33f   :  { %2374 = vmatpush3.bf16.msra.mxu1 %v3222_v24 }
 0x340   :  { %2383 = vmatprep.subr.bf16.mxu1 %v2691_v26 }
 0x342   :  { %2376 = vmatmul.mubr.msk.bf16.vlgmr.msra.gmra.mrb[8].mxu1 %vm194_vm0, %v3171_v5 }
 0x343   :  { %2379 = vmatprep.mubr.msk.bf16.mxu1 %vm194_vm0, %v3173_v6  ;;  %2384 = vmatpush3.bf16.msra.mxu1 %v2691_v26  ;;  %v2702_v26 = vld [vmem:[#allocation7 + $0x98] sm:$0xff]  }
 0x344   :  { %2385 = vmatprep.subr.bf16.mxu1 %v2692_v27 }
 0x347   :  { %2386 = vmatpush3.bf16.msra.mxu1 %v2692_v27  ;;  %v2703_v27 = vld [vmem:[#allocation7 + $0xa0] sm:$0xff]  }
 0x348   :  { %2387 = vmatprep.subr.bf16.mxu1 %v2693_v30 }
 0x34a   :  { %2380 = vmatmul.mubr.msk.bf16.gmra.mrb[12].mxu1 %vm194_vm0, %v3179_v7 }
 0x34b   :  { %2388 = vmatpush3.bf16.msra.mxu1 %v2693_v30  ;;  %v2704_v30 = vld [vmem:[#allocation7 + $0xa8] sm:$0xff]  }
 0x34c   :  { %2389 = vmatprep.subr.bf16.mxu1 %v2694_v31 }
 0x34f   :  { %2390 = vmatpush3.bf16.msra.mxu1 %v2694_v31  ;;  %v2705_v31 = vld [vmem:[#allocation7 + $0xb0] sm:$0xff]  }
 0x350   :  { %2391 = vmatprep.subr.bf16.mxu1 %v2695_v32 }
 0x353   :  { %2392 = vmatpush3.bf16.msra.mxu1 %v2695_v32  ;;  %v2706_v32 = vld [vmem:[#allocation7 + $0xb8] sm:$0xff]  }
 0x354   :  { %2393 = vmatprep.subr.bf16.mxu1 %v2696_v33 }
 0x357   :  { %2394 = vmatpush3.bf16.msra.mxu1 %v2696_v33  ;;  %v2707_v33 = vld [vmem:[#allocation10] sm:$0xff]  }
 0x358   :  { %2395 = vmatprep.subr.bf16.mxu1 %v2697_v34 }
 0x35b   :  { %2396 = vmatpush3.bf16.msra.mxu1 %v2697_v34  ;;  %v2708_v34 = vld [vmem:[#allocation10 + $0x8] sm:$0xff]  }
 0x35c   :  { %2397 = vmatprep.subr.bf16.mxu1 %v2698_v35 }
 0x35f   :  { %2398 = vmatpush3.bf16.msra.mxu1 %v2698_v35  ;;  %v2709_v35 = vld [vmem:[#allocation10 + $0x10] sm:$0xff]  }
 0x360   :  { %2447 = vmatprep.subr.bf16.mxu1 %v2707_v33 }
 0x415   :  { %v2377_v36 = vpop.f32.mrb[8].mxu1 }
 0x416   :  { %v533_v37 = vpop.f32.mrb[9].mxu1 }
 0x417   :  { %v2378_v38 = vpop.f32.mrb[10].mxu1 }
 0x418   :  { %v582_v39 = vpack.c.bf16 %v2378_v38, %v2377_v36  ;;  %v536_v40 = vpop.f32.mrb[11].mxu1  ;;  %v2710_v36 = vld [vmem:[#allocation10 + $0x18] sm:$0xff]   ;;  %v2712_v38 = vld [vmem:[#allocation10 + $0x28] sm:$0xff]  }
 0x419   :  { %v581_v41 = vpack.c.bf16 %v536_v40, %v533_v37  ;;  %v2711_v37 = vld [vmem:[#allocation10 + $0x20] sm:$0xff]  }
 0x41b   :  { %2399 = vmatprep.mubr.bf16.mxu1 %v581_v41 }
 0x41c   :  { %2400 = vmatmul.mubr.bf16.vlgmr.msra.gmra.mrb[16].mxu1 %v582_v39 }
 0x41d   :  { %v2381_v44 = vpop.f32.mrb[12].mxu1  ;;  %2448 = vmatpush3.bf16.msra.mxu1 %v2707_v33  ;;  %v2722_v33 = vld [vmem:[#allocation8 + $0x38] sm:$0xff]  }
 0x41e   :  { %v549_v45 = vpop.f32.mrb[13].mxu1  ;;  %2449 = vmatprep.subr.bf16.mxu1 %v2708_v34 }
 0x41f   :  { %v2382_v46 = vpop.f32.mrb[14].mxu1 }
 0x420   :  { %v584_v47 = vpack.c.bf16 %v2382_v46, %v2381_v44  ;;  %v552_v48 = vpop.f32.mrb[15].mxu1 }
 0x421   :  { %v583_v49 = vpack.c.bf16 %v552_v48, %v549_v45  ;;  %2450 = vmatpush3.bf16.msra.mxu1 %v2708_v34 }
 0x422   :  { %2451 = vmatprep.subr.bf16.mxu1 %v2709_v35 }
 0x423   :  { %2403 = vmatprep.mubr.bf16.mxu1 %v583_v49 }
 0x424   :  { %2404 = vmatmul.mubr.bf16.gmra.mrb[20].mxu1 %v584_v47 }
 0x425   :  { %2452 = vmatpush3.bf16.msra.mxu1 %v2709_v35 }
 0x426   :  { %2453 = vmatprep.subr.bf16.mxu1 %v2710_v36 }
 0x429   :  { %2454 = vmatpush3.bf16.msra.mxu1 %v2710_v36 }
 0x42a   :  { %2455 = vmatprep.subr.bf16.mxu1 %v2711_v37 }
 0x42d   :  { %2456 = vmatpush3.bf16.msra.mxu1 %v2711_v37 }
 0x42e   :  { %2457 = vmatprep.subr.bf16.mxu1 %v2712_v38 }
 0x431   :  { %2458 = vmatpush3.bf16.msra.mxu1 %v2712_v38 }
 0x4ef   :  { %v2401_v51 = vpop.f32.mrb[16].mxu1 }
 0x4f0   :  { %v681_v52 = vadd.f32 %v2401_v51, %v2062_v50  ;;  %v672_v53 = vpop.f32.mrb[17].mxu1 }
 0x4f1   :  { %v673_v54 = vadd.f32 %v2062_v50, %v672_v53  ;;  %v2402_v55 = vpop.f32.mrb[18].mxu1  ;;  %v2713_v53 = vld [vmem:[#allocation10 + $0x30] sm:$0xff]  }
 0x4f2   :  { %v684_v56 = vadd.f32 %v2402_v55, %v2062_v50  ;;  %v675_v57 = vpop.f32.mrb[19].mxu1  ;;  %v705_v59 = vmax.f32 %v681_v52, 0.0  ;;  %2459 = vmatprep.subr.bf16.mxu1 %v2713_v53  ;;  %v2715_v55 = vld [vmem:[#allocation8] sm:$0xff]  }
 0x4f3   :  { %v676_v58 = vadd.f32 %v2062_v50, %v675_v57  ;;  %v703_v61 = vmax.f32 %v673_v54, 0.0  ;;  %2460 = vmatpush3.bf16.msra.mxu1 %v2713_v53  ;;  %v2714_v54 = vld [vmem:[#allocation10 + $0x38] sm:$0xff]   ;;  %v2075_v57 = vld [vmem:[%s3337_s7 + $0x3] ss:$0 sm:$0xff] }
 0x4f4   :  { %v706_v60 = vmax.f32 %v684_v56, 0.0  ;;  %2461 = vmatprep.subr.bf16.mxu1 %v2714_v54 }
 0x4f5   :  { %v704_v62 = vmax.f32 %v676_v58, 0.0 }
 0x4f6   :  { %v3240_v63 = vpack.c.bf16 %v706_v60, %v705_v59 }
 0x4f7   :  { %v3242_v0 = vpack.c.bf16 %v704_v62, %v703_v61  ;;  %v2405_v1 = vpop.f32.mrb[20].mxu1  ;;  %2462 = vmatpush3.bf16.msra.mxu1 %v2714_v54 }
 0x4f8   :  { %v697_v2 = vadd.f32 %v2405_v1, %v2062_v50  ;;  %v688_v4 = vpop.f32.mrb[21].mxu1  ;;  %2471 = vmatprep.subr.bf16.mxu1 %v2715_v55 }
 0x4f9   :  { %v689_v8 = vadd.f32 %v2062_v50, %v688_v4  ;;  %v2406_v9 = vpop.f32.mrb[22].mxu1  ;;  %2407 = vmatprep.subr.bf16.mxu0 %v3242_v0 }
 0x4fa   :  { %v700_v12 = vadd.f32 %v2406_v9, %v2062_v50  ;;  %v691_v13 = vpop.f32.mrb[23].mxu1  ;;  %2408 = vmatpush3.bf16.msra.mxu0 %v3242_v0  ;;  %v709_v15 = vmax.f32 %v697_v2, 0.0  ;;  %v2716_v9 = vld [vmem:[#allocation8 + $0x8] sm:$0xff]  }
 0x4fb   :  { %v692_v14 = vadd.f32 %v2062_v50, %v691_v13  ;;  %2409 = vmatprep.subr.bf16.mxu0 %v3240_v63  ;;  %v707_v17 = vmax.f32 %v689_v8, 0.0 }
 0x4fc   :  { %v710_v16 = vmax.f32 %v700_v12, 0.0 }
 0x4fd   :  { %v708_v18 = vmax.f32 %v692_v14, 0.0 }
 0x4fe   :  { %v3247_v19 = vpack.c.bf16 %v710_v16, %v709_v15  ;;  %2410 = vmatpush3.bf16.msra.mxu0 %v3240_v63 }
 0x4ff   :  { %v3250_v20 = vpack.c.bf16 %v708_v18, %v707_v17 }
 0x501   :  { %2411 = vmatprep.subr.bf16.mxu0 %v3250_v20 }
 0x502   :  { %2412 = vmatpush3.bf16.msra.mxu0 %v3250_v20 }
 0x503   :  { %2413 = vmatprep.subr.bf16.mxu0 %v3247_v19 }
 0x506   :  { %2414 = vmatpush3.bf16.msra.mxu0 %v3247_v19 }
 0x507   :  { %2423 = vmatprep.subr.bf16.mxu0 %v2699_v21 }
 0x509   :  { %2416 = vmatmul.mubr.msk.bf16.vlgmr.msra.gmra.mrb[16].mxu0 %vm194_vm0, %v3171_v5 }
 0x50a   :  { %2419 = vmatprep.mubr.msk.bf16.mxu0 %vm194_vm0, %v3173_v6  ;;  %2424 = vmatpush3.bf16.msra.mxu0 %v2699_v21  ;;  %v2717_v21 = vld [vmem:[#allocation8 + $0x10] sm:$0xff]  }
 0x50b   :  { %2425 = vmatprep.subr.bf16.mxu0 %v2700_v22 }
 0x50e   :  { %2426 = vmatpush3.bf16.msra.mxu0 %v2700_v22 }
 0x50f   :  { %2427 = vmatprep.subr.bf16.mxu0 %v2701_v23 }
 0x511   :  { %2420 = vmatmul.mubr.msk.bf16.gmra.mrb[20].mxu0 %vm194_vm0, %v3179_v7 }
 0x512   :  { %2428 = vmatpush3.bf16.msra.mxu0 %v2701_v23 }
 0x513   :  { %2429 = vmatprep.subr.bf16.mxu0 %v2702_v26 }
 0x516   :  { %2430 = vmatpush3.bf16.msra.mxu0 %v2702_v26 }
 0x517   :  { %2431 = vmatprep.subr.bf16.mxu0 %v2703_v27 }
 0x51a   :  { %2432 = vmatpush3.bf16.msra.mxu0 %v2703_v27  ;;  %v2718_v27 = vld [vmem:[#allocation8 + $0x18] sm:$0xff]  }
 0x51b   :  { %2433 = vmatprep.subr.bf16.mxu0 %v2704_v30 }
 0x51e   :  { %2434 = vmatpush3.bf16.msra.mxu0 %v2704_v30  ;;  %v2719_v30 = vld [vmem:[#allocation8 + $0x20] sm:$0xff]  }
 0x51f   :  { %2435 = vmatprep.subr.bf16.mxu0 %v2705_v31 }
 0x522   :  { %2436 = vmatpush3.bf16.msra.mxu0 %v2705_v31  ;;  %v2720_v31 = vld [vmem:[#allocation8 + $0x28] sm:$0xff]  }
 0x523   :  { %2437 = vmatprep.subr.bf16.mxu0 %v2706_v32 }
 0x526   :  { %2438 = vmatpush3.bf16.msra.mxu0 %v2706_v32  ;;  %v2721_v32 = vld [vmem:[#allocation8 + $0x30] sm:$0xff]  }
 0x5dc   :  { %v2417_v39 = vpop.f32.mrb[16].mxu0 }
 0x5dd   :  { %v749_v40 = vpop.f32.mrb[17].mxu0 }
 0x5de   :  { %v2418_v41 = vpop.f32.mrb[18].mxu0 }
 0x5df   :  { %v798_v44 = vpack.c.bf16 %v2418_v41, %v2417_v39  ;;  %v752_v45 = vpop.f32.mrb[19].mxu0 }
 0x5e0   :  { %v797_v46 = vpack.c.bf16 %v752_v45, %v749_v40  ;;  %v2725_v45 = vld [vmem:[#allocation10 + $0x50] sm:$0xff]  }
 0x5e2   :  { %2439 = vmatprep.mubr.bf16.mxu0 %v797_v46  ;;  %v2726_v46 = vld [vmem:[#allocation10 + $0x58] sm:$0xff]  }
 0x5e3   :  { %2440 = vmatmul.mubr.bf16.vlgmr.msra.gmra.mrb[24].mxu0 %v798_v44 }
 0x5e4   :  { %v2421_v47 = vpop.f32.mrb[20].mxu0 }
 0x5e5   :  { %v765_v48 = vpop.f32.mrb[21].mxu0 }
 0x5e6   :  { %v2422_v49 = vpop.f32.mrb[22].mxu0 }
 0x5e7   :  { %v800_v50 = vpack.c.bf16 %v2422_v49, %v2421_v47  ;;  %v768_v51 = vpop.f32.mrb[23].mxu0  ;;  %v2727_v47 = vld [vmem:[#allocation10 + $0x60] sm:$0xff]  }
 0x5e8   :  { %v799_v52 = vpack.c.bf16 %v768_v51, %v765_v48  ;;  %v2728_v48 = vld [vmem:[#allocation10 + $0x68] sm:$0xff]   ;;  %v2731_v49 = vld [vmem:[#allocation8 + $0x40] sm:$0xff]  }
 0x5ea   :  { %2443 = vmatprep.mubr.bf16.mxu0 %v799_v52 }
 0x5eb   :  { %2444 = vmatmul.mubr.bf16.gmra.mrb[28].mxu0 %v800_v50 }
 0x5ec   :  { %2503 = vmatprep.mubr.msk.bf16.mxu0 %vm194_vm0, %v3165_v3 }
 0x6b6   :  { %v2441_v56 = vpop.f32.mrb[24].mxu0 }
 0x6b7   :  { %v888_v58 = vpop.f32.mrb[25].mxu0  ;;  %v897_v60 = vadd.f32 %v2441_v56, %v2075_v57 }
 0x6b8   :  { %v2442_v59 = vpop.f32.mrb[26].mxu0  ;;  %v889_v1 = vadd.f32 %v2075_v57, %v888_v58 }
 0x6b9   :  { %v900_v61 = vadd.f32 %v2442_v59, %v2075_v57  ;;  %v891_v62 = vpop.f32.mrb[27].mxu0 }
 0x6ba   :  { %v892_v2 = vadd.f32 %v2075_v57, %v891_v62 }
 0x6bb   :  { %v952_v4 = vpack.c.bf16 %v900_v61, %v897_v60 }
 0x6bc   :  { %v951_v8 = vpack.c.bf16 %v892_v2, %v889_v1 }
 0x6be   :  { %v2445_v12 = vpop.f32.mrb[28].mxu0  ;;  %2463 = vmatprep.mubr.bf16.mxu1 %v951_v8 }
 0x6bf   :  { %v913_v13 = vadd.f32 %v2445_v12, %v2075_v57  ;;  %v904_v14 = vpop.f32.mrb[29].mxu0  ;;  %2464 = vmatmul.mubr.bf16.vlgmr.msra.gmra.mrb[24].mxu1 %v952_v4 }
 0x6c0   :  { %v905_v15 = vadd.f32 %v2075_v57, %v904_v14  ;;  %2472 = vmatpush3.bf16.msra.mxu1 %v2715_v55  ;;  %v2446_v16 = vpop.f32.mrb[30].mxu0 }
 0x6c1   :  { %v916_v17 = vadd.f32 %v2446_v16, %v2075_v57  ;;  %v907_v18 = vpop.f32.mrb[31].mxu0  ;;  %2473 = vmatprep.subr.bf16.mxu1 %v2716_v9 }
 0x6c2   :  { %v908_v22 = vadd.f32 %v2075_v57, %v907_v18 }
 0x6c3   :  { %v954_v23 = vpack.c.bf16 %v916_v17, %v913_v13 }
 0x6c4   :  { %v953_v26 = vpack.c.bf16 %v908_v22, %v905_v15  ;;  %2474 = vmatpush3.bf16.msra.mxu1 %v2716_v9  ;;  %v2732_v9 = vld [vmem:[#allocation8 + $0x48] sm:$0xff]   ;;  %v2733_v22 = vld [vmem:[#allocation8 + $0x50] sm:$0xff]  }
 0x6c5   :  { %2475 = vmatprep.subr.bf16.mxu1 %v2717_v21 }
 0x6c6   :  { %2467 = vmatprep.mubr.bf16.mxu1 %v953_v26 }
 0x6c7   :  { %2468 = vmatmul.mubr.bf16.gmra.mrb[28].mxu1 %v954_v23 }
 0x6c8   :  { %2476 = vmatpush3.bf16.msra.mxu1 %v2717_v21  ;;  %2487 = vmatprep.mubr.bf16.mxu1 %v3242_v0 }
 0x6c9   :  { %2477 = vmatprep.subr.bf16.mxu1 %v2718_v27 }
 0x6cc   :  { %2478 = vmatpush3.bf16.msra.mxu1 %v2718_v27 }
 0x6cd   :  { %2479 = vmatprep.subr.bf16.mxu1 %v2719_v30 }
 0x6d0   :  { %2480 = vmatpush3.bf16.msra.mxu1 %v2719_v30  ;;  %v2734_v30 = vld [vmem:[#allocation8 + $0x58] sm:$0xff]  }
 0x6d1   :  { %2481 = vmatprep.subr.bf16.mxu1 %v2720_v31 }
 0x6d4   :  { %2482 = vmatpush3.bf16.msra.mxu1 %v2720_v31  ;;  %v2735_v31 = vld [vmem:[#allocation8 + $0x60] sm:$0xff]  }
 0x6d5   :  { %2483 = vmatprep.subr.bf16.mxu1 %v2721_v32 }
 0x6d8   :  { %2484 = vmatpush3.bf16.msra.mxu1 %v2721_v32  ;;  %v2736_v32 = vld [vmem:[#allocation8 + $0x68] sm:$0xff]  }
 0x6d9   :  { %2485 = vmatprep.subr.bf16.mxu1 %v2722_v33 }
 0x6dc   :  { %2486 = vmatpush3.bf16.msra.mxu1 %v2722_v33  ;;  %v2737_v33 = vld [vmem:[#allocation8 + $0x70] sm:$0xff]  }
 0x6df   :  { %2488 = vmatmul.mubr.bf16.vlgmr.msra.gmra.mrb[24].mxu1 %v3240_v63 }
 0x6e0   :  { %2491 = vmatprep.mubr.bf16.mxu1 %v3250_v20 }
 0x6e7   :  { %2492 = vmatmul.mubr.bf16.gmra.mrb[28].mxu1 %v3247_v19  ;;  %v2724_v19 = vld [vmem:[#allocation10 + $0x48] sm:$0xff]  }
 0x6e8   :  { %2567 = vmatprep.mubr.msk.bf16.mxu1 %vm194_vm0, %v3165_v3  ;;  %v2723_v3 = vld [vmem:[#allocation10 + $0x40] sm:$0xff]  }
 0x7b2   :  { %v2489_v0 = vpop.f32.mrb[24].mxu1 }
 0x7b3   :  { %v1150_v34 = vpop.f32.mrb[25].mxu1 }
 0x7b4   :  { %v2490_v35 = vpop.f32.mrb[26].mxu1 }
 0x7b5   :  { %v1182_v36 = vpack.c.bf16 %v2490_v35, %v2489_v0  ;;  %v1153_v37 = vpop.f32.mrb[27].mxu1  ;;  %v2738_v0 = vld [vmem:[#allocation8 + $0x78] sm:$0xff]  }
 0x7b6   :  { %v1181_v38 = vpack.c.bf16 %v1153_v37, %v1150_v34 }
 0x7b8   :  { %2495 = vmatprep.subr.bf16.mxu0 %v1181_v38 }
 0x7b9   :  { %2496 = vmatpush3.bf16.msra.mxu0 %v1181_v38 }
 0x7ba   :  { %v2493_v39 = vpop.f32.mrb[28].mxu1  ;;  %2497 = vmatprep.subr.bf16.mxu0 %v1182_v36 }
 0x7bb   :  { %v1166_v40 = vpop.f32.mrb[29].mxu1 }
 0x7bc   :  { %v2494_v41 = vpop.f32.mrb[30].mxu1 }
 0x7bd   :  { %v1184_v63 = vpack.c.bf16 %v2494_v41, %v2493_v39  ;;  %v1169_v44 = vpop.f32.mrb[31].mxu1  ;;  %2498 = vmatpush3.bf16.msra.mxu0 %v1182_v36 }
 0x7be   :  { %v1183_v20 = vpack.c.bf16 %v1169_v44, %v1166_v40 }
 0x7c0   :  { %2499 = vmatprep.subr.bf16.mxu0 %v1183_v20 }
 0x7c1   :  { %2500 = vmatpush3.bf16.msra.mxu0 %v1183_v20  ;;  %v2740_v20 = vld [vmem:[#allocation11 + $0x48] sm:$0xff]  }
 0x7c2   :  { %2501 = vmatprep.subr.bf16.mxu0 %v1184_v63 }
 0x7c5   :  { %2502 = vmatpush3.bf16.msra.mxu0 %v1184_v63 }
 0x7c6   :  { %2511 = vmatprep.subr.bf16.mxu0 %v2723_v3 }
 0x7c8   :  { %2504 = vmatmul.mubr.msk.bf16.vlgmr.msra.gmra.mrb[32].mxu0 %vm194_vm0, %v3171_v5  ;;  %v2729_v5 = vld [vmem:[#allocation10 + $0x70] sm:$0xff]  }
 0x7c9   :  { %2507 = vmatprep.mubr.msk.bf16.mxu0 %vm194_vm0, %v3173_v6  ;;  %2512 = vmatpush3.bf16.msra.mxu0 %v2723_v3  ;;  %v2730_v6 = vld [vmem:[#allocation10 + $0x78] sm:$0xff]   ;;  %v3287_v3 = vld [vmem:[#allocation2 + $0x8] sm:$0xff]  }
 0x7ca   :  { %2513 = vmatprep.subr.bf16.mxu0 %v2724_v19 }
 0x7cd   :  { %2514 = vmatpush3.bf16.msra.mxu0 %v2724_v19  ;;  %v3291_v19 = vld [vmem:[#allocation2 + $0x10] sm:$0xff]  }
 0x7ce   :  { %2515 = vmatprep.subr.bf16.mxu0 %v2725_v45 }
 0x7d0   :  { %2508 = vmatmul.mubr.msk.bf16.gmra.mrb[36].mxu0 %vm194_vm0, %v3179_v7  ;;  %v2100_v7 = vld [vmem:[%s3337_s7 + $0x4] ss:$0 sm:$0xff] }
 0x7d1   :  { %2516 = vmatpush3.bf16.msra.mxu0 %v2725_v45  ;;  %v2741_v45 = vld [vmem:[#allocation11 + $0x50] sm:$0xff]  }
 0x7d2   :  { %2517 = vmatprep.subr.bf16.mxu0 %v2726_v46 }
 0x7d5   :  { %2518 = vmatpush3.bf16.msra.mxu0 %v2726_v46  ;;  %v2742_v46 = vld [vmem:[#allocation11 + $0x58] sm:$0xff]  }
 0x7d6   :  { %2519 = vmatprep.subr.bf16.mxu0 %v2727_v47 }
 0x7d9   :  { %2520 = vmatpush3.bf16.msra.mxu0 %v2727_v47  ;;  %v3295_v47 = vld [vmem:[#allocation2 + $0x18] sm:$0xff]  }
 0x7da   :  { %2521 = vmatprep.subr.bf16.mxu0 %v2728_v48 }
 0x7dd   :  { %2522 = vmatpush3.bf16.msra.mxu0 %v2728_v48  ;;  %v2743_v48 = vld [vmem:[#allocation11 + $0x60] sm:$0xff]  }
 0x7de   :  { %2523 = vmatprep.subr.bf16.mxu0 %v2729_v5 }
 0x7e1   :  { %2524 = vmatpush3.bf16.msra.mxu0 %v2729_v5  ;;  %v2744_v5 = vld [vmem:[#allocation11 + $0x68] sm:$0xff]  }
 0x7e2   :  { %2525 = vmatprep.subr.bf16.mxu0 %v2730_v6 }
 0x7e5   :  { %2526 = vmatpush3.bf16.msra.mxu0 %v2730_v6  ;;  %v2745_v6 = vld [vmem:[#allocation11 + $0x70] sm:$0xff]  }
 0x7e6   :  { %2535 = vmatprep.subr.bf16.mxu0 %v2731_v49 }
 0x89b   :  { %v2505_v50 = vpop.f32.mrb[32].mxu0 }
 0x89c   :  { %v1233_v51 = vadd.f32 %v2505_v50, %v2100_v7  ;;  %v1224_v52 = vpop.f32.mrb[33].mxu0  ;;  %v2121_v50 = vld [vmem:[%s3337_s7 + $0x5] ss:$0 sm:$0xff] }
 0x89d   :  { %v1225_v53 = vadd.f32 %v2100_v7, %v1224_v52  ;;  %v2506_v54 = vpop.f32.mrb[34].mxu0 }
 0x89e   :  { %v1236_v55 = vadd.f32 %v2506_v54, %v2100_v7  ;;  %v1227_v56 = vpop.f32.mrb[35].mxu0  ;;  %v1257_v58 = vmax.f32 %v1233_v51, 0.0 }
 0x89f   :  { %v1228_v57 = vadd.f32 %v2100_v7, %v1227_v56  ;;  %v1255_v60 = vmax.f32 %v1225_v53, 0.0 }
 0x8a0   :  { %v1258_v59 = vmax.f32 %v1236_v55, 0.0 }
 0x8a1   :  { %v1256_v61 = vmax.f32 %v1228_v57, 0.0 }
 0x8a2   :  { %v1298_v62 = vpack.c.bf16 %v1258_v59, %v1257_v58 }
 0x8a3   :  { %v1297_v1 = vpack.c.bf16 %v1256_v61, %v1255_v60  ;;  %v2509_v2 = vpop.f32.mrb[36].mxu0 }
 0x8a4   :  { %v1249_v4 = vadd.f32 %v2509_v2, %v2100_v7  ;;  %v1240_v8 = vpop.f32.mrb[37].mxu0 }
 0x8a5   :  { %v1241_v12 = vadd.f32 %v2100_v7, %v1240_v8  ;;  %v2510_v13 = vpop.f32.mrb[38].mxu0  ;;  %2527 = vmatprep.mubr.bf16.mxu0 %v1297_v1 }
 0x8a6   :  { %v1261_v14 = vmax.f32 %v1249_v4, 0.0  ;;  %v1252_v15 = vadd.f32 %v2510_v13, %v2100_v7  ;;  %v1243_v16 = vpop.f32.mrb[39].mxu0  ;;  %2528 = vmatmul.mubr.bf16.vlgmr.msra.gmra.mrb[40].mxu0 %v1298_v62 }
 0x8a7   :  { %v1259_v17 = vmax.f32 %v1241_v12, 0.0  ;;  %v1244_v18 = vadd.f32 %v2100_v7, %v1243_v16  ;;  %2536 = vmatpush3.bf16.msra.mxu0 %v2731_v49  ;;  %v2746_v49 = vld [vmem:[#allocation11 + $0x78] sm:$0xff]   ;;  %v2747_v7 = vld [vmem:[#allocation11] sm:$0xff]   ;;  %v2748_v12 = vld [vmem:[#allocation11 + $0x8] sm:$0xff]  }
 0x8a8   :  { %v1262_v21 = vmax.f32 %v1252_v15, 0.0  ;;  %2537 = vmatprep.subr.bf16.mxu0 %v2732_v9 }
 0x8a9   :  { %v1260_v23 = vmax.f32 %v1244_v18, 0.0 }
 0x8aa   :  { %v1300_v26 = vpack.c.bf16 %v1262_v21, %v1261_v14 }
 0x8ab   :  { %v1299_v27 = vpack.c.bf16 %v1260_v23, %v1259_v17  ;;  %2538 = vmatpush3.bf16.msra.mxu0 %v2732_v9  ;;  %v2749_v23 = vld [vmem:[#allocation11 + $0x10] sm:$0xff]  }
 0x8ac   :  { %2539 = vmatprep.subr.bf16.mxu0 %v2733_v22 }
 0x8ad   :  { %2531 = vmatprep.mubr.bf16.mxu0 %v1299_v27 }
 0x8ae   :  { %2532 = vmatmul.mubr.bf16.gmra.mrb[44].mxu0 %v1300_v26 }
 0x8af   :  { %2540 = vmatpush3.bf16.msra.mxu0 %v2733_v22  ;;  %2551 = vmatprep.mubr.bf16.mxu0 %v3217_v11  ;;  %v2787_v11 = vld [vmem:[#allocation2] sm:$0xff]  }
 0x8b0   :  { %2541 = vmatprep.subr.bf16.mxu0 %v2734_v30 }
 0x8b3   :  { %2542 = vmatpush3.bf16.msra.mxu0 %v2734_v30 }
 0x8b4   :  { %2543 = vmatprep.subr.bf16.mxu0 %v2735_v31 }
 0x8b7   :  { %2544 = vmatpush3.bf16.msra.mxu0 %v2735_v31  ;;  %v2750_v31 = vld [vmem:[#allocation11 + $0x18] sm:$0xff]  }
 0x8b8   :  { %2545 = vmatprep.subr.bf16.mxu0 %v2736_v32 }
 0x8bb   :  { %2546 = vmatpush3.bf16.msra.mxu0 %v2736_v32  ;;  %v2751_v32 = vld [vmem:[#allocation11 + $0x20] sm:$0xff]  }
 0x8bc   :  { %2547 = vmatprep.subr.bf16.mxu0 %v2737_v33 }
 0x8bf   :  { %2548 = vmatpush3.bf16.msra.mxu0 %v2737_v33  ;;  %v2752_v33 = vld [vmem:[#allocation11 + $0x28] sm:$0xff]  }
 0x8c0   :  { %2549 = vmatprep.subr.bf16.mxu0 %v2738_v0 }
 0x8c3   :  { %2550 = vmatpush3.bf16.msra.mxu0 %v2738_v0  ;;  %v2753_v0 = vld [vmem:[#allocation11 + $0x30] sm:$0xff]  }
 0x8c6   :  { %2552 = vmatmul.mubr.bf16.vlgmr.msra.gmra.mrb[40].mxu0 %v3215_v10 }
 0x8c7   :  { %2555 = vmatprep.mubr.bf16.mxu0 %v3225_v25 }
 0x8ce   :  { %2556 = vmatmul.mubr.bf16.gmra.mrb[44].mxu0 %v3222_v24  ;;  %v2739_v24 = vld [vmem:[#allocation11 + $0x40] sm:$0xff]  }
 0x8cf   :  { %2631 = vmatprep.mubr.msk.bf16.mxu0 %vm194_vm0, %v2787_v11  ;;  %v2754_v11 = vld [vmem:[#allocation11 + $0x38] sm:$0xff]  }
 0x999   :  { %v2553_v34 = vpop.f32.mrb[40].mxu0 }
 0x99a   :  { %v1496_v35 = vpop.f32.mrb[41].mxu0 }
 0x99b   :  { %v2554_v36 = vpop.f32.mrb[42].mxu0 }
 0x99c   :  { %v1528_v37 = vpack.c.bf16 %v2554_v36, %v2553_v34  ;;  %v1499_v38 = vpop.f32.mrb[43].mxu0  ;;  %v1874_v34 = vld [vmem:[#allocation13 + $0x10] sm:$0xff] }
 0x99d   :  { %v1527_v39 = vpack.c.bf16 %v1499_v38, %v1496_v35  ;;  %v1875_v35 = vld [vmem:[#allocation13 + $0x18] sm:$0xff]  ;;  %v1873_v38 = vld [vmem:[#allocation13 + $0x8] sm:$0xff] }
 0x99f   :  { %2559 = vmatprep.subr.bf16.mxu1 %v1527_v39 }
 0x9a0   :  { %2560 = vmatpush3.bf16.msra.mxu1 %v1527_v39 }
 0x9a1   :  { %v2557_v40 = vpop.f32.mrb[44].mxu0  ;;  %2561 = vmatprep.subr.bf16.mxu1 %v1528_v37 }
 0x9a2   :  { %v1512_v41 = vpop.f32.mrb[45].mxu0 }
 0x9a3   :  { %v2558_v63 = vpop.f32.mrb[46].mxu0 }
 0x9a4   :  { %v1530_v10 = vpack.c.bf16 %v2558_v63, %v2557_v40  ;;  %v1515_v44 = vpop.f32.mrb[47].mxu0  ;;  %2562 = vmatpush3.bf16.msra.mxu1 %v1528_v37  ;;  %v1872_v37 = vld [vmem:[#allocation13] sm:$0xff] }
 0x9a5   :  { %v1529_v25 = vpack.c.bf16 %v1515_v44, %v1512_v41 }
 0x9a7   :  { %2563 = vmatprep.subr.bf16.mxu1 %v1529_v25 }
 0x9a8   :  { %2564 = vmatpush3.bf16.msra.mxu1 %v1529_v25 }
 0x9a9   :  { %2565 = vmatprep.subr.bf16.mxu1 %v1530_v10 }
 0x9ac   :  { %2566 = vmatpush3.bf16.msra.mxu1 %v1530_v10 }
 0x9ad   :  { %2575 = vmatprep.subr.bf16.mxu1 %v2739_v24 }
 0x9af   :  { %2568 = vmatmul.mubr.msk.bf16.vlgmr.msra.gmra.mrb[32].mxu1 %vm194_vm0, %v3287_v3 }
 0x9b0   :  { %2571 = vmatprep.mubr.msk.bf16.mxu1 %vm194_vm0, %v3291_v19  ;;  %2576 = vmatpush3.bf16.msra.mxu1 %v2739_v24 }
 0x9b1   :  { %2577 = vmatprep.subr.bf16.mxu1 %v2740_v20 }
 0x9b4   :  { %2578 = vmatpush3.bf16.msra.mxu1 %v2740_v20 }
 0x9b5   :  { %2579 = vmatprep.subr.bf16.mxu1 %v2741_v45 }
 0x9b7   :  { %2572 = vmatmul.mubr.msk.bf16.gmra.mrb[36].mxu1 %vm194_vm0, %v3295_v47 }
 0x9b8   :  { %2580 = vmatpush3.bf16.msra.mxu1 %v2741_v45 }
 0x9b9   :  { %2581 = vmatprep.subr.bf16.mxu1 %v2742_v46 }
 0x9bc   :  { %2582 = vmatpush3.bf16.msra.mxu1 %v2742_v46  ;;  %v1877_v46 = vld [vmem:[#allocation13 + $0x28] sm:$0xff] }
 0x9bd   :  { %2583 = vmatprep.subr.bf16.mxu1 %v2743_v48 }
 0x9c0   :  { %2584 = vmatpush3.bf16.msra.mxu1 %v2743_v48 }
 0x9c1   :  { %2585 = vmatprep.subr.bf16.mxu1 %v2744_v5 }
 0x9c4   :  { %2586 = vmatpush3.bf16.msra.mxu1 %v2744_v5 }
 0x9c5   :  { %2587 = vmatprep.subr.bf16.mxu1 %v2745_v6 }
 0x9c8   :  { %2588 = vmatpush3.bf16.msra.mxu1 %v2745_v6 }
 0x9c9   :  { %2589 = vmatprep.subr.bf16.mxu1 %v2746_v49 }
 0x9cc   :  { %2590 = vmatpush3.bf16.msra.mxu1 %v2746_v49 }
 0x9cd   :  { %2599 = vmatprep.subr.bf16.mxu1 %v2747_v7 }
 0xa82   :  { %v2569_v51 = vpop.f32.mrb[32].mxu1 }
 0xa83   :  { %v1579_v52 = vadd.f32 %v2569_v51, %v2121_v50  ;;  %v1570_v53 = vpop.f32.mrb[33].mxu1 }
 0xa84   :  { %v1571_v54 = vadd.f32 %v2121_v50, %v1570_v53  ;;  %v2570_v55 = vpop.f32.mrb[34].mxu1  ;;  %v2142_v53 = vld [vmem:[%s3338_s8] ss:$0 sm:$0xff]  ;;  %s2988_s8 = smov [#allocation14]  }
 0xa85   :  { %v1582_v56 = vadd.f32 %v2570_v55, %v2121_v50  ;;  %v1573_v57 = vpop.f32.mrb[35].mxu1  ;;  %v1603_v59 = vmax.f32 %v1579_v52, 0.0  ;;  %s2017_s15 = sshll.u32 %s2988_s8, 4  ;;  %s2018_s15 = int_to_ptr.vmem [resolvable:$true] %s2017_s15 }
 0xa86   :  { %v1574_v58 = vadd.f32 %v2121_v50, %v1573_v57  ;;  %v1601_v61 = vmax.f32 %v1571_v54, 0.0  ;;  %s2945_s16 = scalar_lea.vmem %s2018_s15, 1024  ;;  %p2950_p1 = scmp.lt.s32.totalorder %s2018_s15, %s2018_s15 }
 0xa87   :  { %v1604_v60 = vmax.f32 %v1582_v56, 0.0  ;;  %p2946_p0 = scmp.ne.s32.totalorder %s2018_s15, %s2945_s16  ;;  %p2951_p2 = scmp.lt.s32.totalorder %s2945_s16, %s2945_s16 }
 0xa88   :  { %v1602_v62 = vmax.f32 %v1574_v58, 0.0 }
 0xa89   :  { %v1643_v1 = vpack.c.bf16 %v1604_v60, %v1603_v59  ;;  %p2952_p3 = por %p2951_p2, %p2950_p1 }
 0xa8a   :  { %v1642_v2 = vpack.c.bf16 %v1602_v62, %v1601_v61  ;;  %v2573_v4 = vpop.f32.mrb[36].mxu1 }
 0xa8b   :  { %v1595_v8 = vadd.f32 %v2573_v4, %v2121_v50  ;;  %v1586_v9 = vpop.f32.mrb[37].mxu1  ;;  %p2953_p4 = pnand %p2952_p3, %p2946_p0 }
 0xa8c   :  { %v1587_v13 = vadd.f32 %v2121_v50, %v1586_v9  ;;  %v2574_v14 = vpop.f32.mrb[38].mxu1  ;;  %2591 = vmatprep.mubr.bf16.mxu1 %v1642_v2 }
 0xa8d   :  { %v1607_v15 = vmax.f32 %v1595_v8, 0.0  ;;  %v1598_v16 = vadd.f32 %v2574_v14, %v2121_v50  ;;  %v1589_v17 = vpop.f32.mrb[39].mxu1  ;;  %2592 = vmatmul.mubr.bf16.vlgmr.msra.gmra.mrb[40].mxu1 %v1643_v1 }
 0xa8e   :  { %v1605_v18 = vmax.f32 %v1587_v13, 0.0  ;;  %v1590_v21 = vadd.f32 %v2121_v50, %v1589_v17  ;;  %2600 = vmatpush3.bf16.msra.mxu1 %v2747_v7 }
 0xa8f   :  { %v1608_v22 = vmax.f32 %v1598_v16, 0.0  ;;  %2601 = vmatprep.subr.bf16.mxu1 %v2748_v12 }
 0xa90   :  { %v1606_v26 = vmax.f32 %v1590_v21, 0.0 }
 0xa91   :  { %v1645_v27 = vpack.c.bf16 %v1608_v22, %v1607_v15 }
 0xa92   :  { %v1644_v30 = vpack.c.bf16 %v1606_v26, %v1605_v18  ;;  %2602 = vmatpush3.bf16.msra.mxu1 %v2748_v12 }
 0xa93   :  { %2603 = vmatprep.subr.bf16.mxu1 %v2749_v23 }
 0xa94   :  { %2595 = vmatprep.mubr.bf16.mxu1 %v1644_v30 }
 0xa95   :  { %2596 = vmatmul.mubr.bf16.gmra.mrb[44].mxu1 %v1645_v27 }
 0xa96   :  { %2604 = vmatpush3.bf16.msra.mxu1 %v2749_v23  ;;  %2615 = vmatprep.mubr.bf16.mxu1 %v3188_v29 }
 0xa97   :  { %2605 = vmatprep.subr.bf16.mxu1 %v2750_v31 }
 0xa9a   :  { %2606 = vmatpush3.bf16.msra.mxu1 %v2750_v31 }
 0xa9b   :  { %2607 = vmatprep.subr.bf16.mxu1 %v2751_v32 }
 0xa9e   :  { %2608 = vmatpush3.bf16.msra.mxu1 %v2751_v32 }
 0xa9f   :  { %2609 = vmatprep.subr.bf16.mxu1 %v2752_v33 }
 0xaa2   :  { %2610 = vmatpush3.bf16.msra.mxu1 %v2752_v33 }
 0xaa3   :  { %2611 = vmatprep.subr.bf16.mxu1 %v2753_v0 }
 0xaa6   :  { %2612 = vmatpush3.bf16.msra.mxu1 %v2753_v0 }
 0xaa7   :  { %2613 = vmatprep.subr.bf16.mxu1 %v2754_v11 }
 0xaaa   :  { %2614 = vmatpush3.bf16.msra.mxu1 %v2754_v11 }
 0xaad   :  { %2616 = vmatmul.mubr.bf16.vlgmr.msra.gmra.mrb[40].mxu1 %v3186_v28  ;;  %v1878_v28 = vld [vmem:[#allocation13 + $0x30] sm:$0xff] }
 0xaae   :  { %2619 = vmatprep.mubr.bf16.mxu1 %v3196_v43  ;;  %v1879_v43 = vld [vmem:[#allocation13 + $0x38] sm:$0xff] }
 0xab5   :  { %2620 = vmatmul.mubr.bf16.gmra.mrb[44].mxu1 %v3193_v42  ;;  %v1876_v42 = vld [vmem:[#allocation13 + $0x20] sm:$0xff] }
 0xb80   :  { %v2617_v29 = vpop.f32.mrb[40].mxu1 }
 0xb81   :  { %v1841_v36 = vpop.f32.mrb[41].mxu1  ;;  %v1882_v40 = vadd.f32 %v2617_v29, %v1874_v34 }
 0xb82   :  { %v2618_v39 = vpop.f32.mrb[42].mxu1  ;;  %v1880_v10 = vadd.f32 %v1872_v37, %v1841_v36 }
 0xb83   :  { %v1883_v41 = vadd.f32 %v2618_v39, %v1875_v35  ;;  %v1844_v63 = vpop.f32.mrb[43].mxu1 }
 0xb84   :  { %v1881_v44 = vadd.f32 %v1873_v38, %v1844_v63 }
 0xb85   :  { %v1889_v25 = vpack.c.bf16 %v1883_v41, %v1882_v40 }
 0xb86   :  { %v1888_v24 = vpack.c.bf16 %v1881_v44, %v1880_v10 }
 0xb88   :  { %v2621_v20 = vpop.f32.mrb[44].mxu1  ;;  %2623 = vmatprep.subr.bf16.mxu0 %v1888_v24 }
 0xb89   :  { %v1857_v45 = vpop.f32.mrb[45].mxu1  ;;  %2624 = vmatpush3.bf16.msra.mxu0 %v1888_v24  ;;  %v1886_v5 = vadd.f32 %v2621_v20, %v1878_v28 }
 0xb8a   :  { %v2622_v48 = vpop.f32.mrb[46].mxu1  ;;  %2625 = vmatprep.subr.bf16.mxu0 %v1889_v25  ;;  %v1884_v7 = vadd.f32 %v1876_v42, %v1857_v45 }
 0xb8b   :  { %v1887_v6 = vadd.f32 %v2622_v48, %v1879_v43  ;;  %v1860_v49 = vpop.f32.mrb[47].mxu1 }
 0xb8c   :  { %v1885_v50 = vadd.f32 %v1877_v46, %v1860_v49 }
 0xb8d   :  { %v1891_v51 = vpack.c.bf16 %v1887_v6, %v1886_v5  ;;  %2626 = vmatpush3.bf16.msra.mxu0 %v1889_v25 }
 0xb8e   :  { %v1890_v52 = vpack.c.bf16 %v1885_v50, %v1884_v7 }
 0xb90   :  { %2627 = vmatprep.subr.bf16.mxu0 %v1890_v52 }
 0xb91   :  { %2628 = vmatpush3.bf16.msra.mxu0 %v1890_v52 }
 0xb92   :  { %2629 = vmatprep.subr.bf16.mxu0 %v1891_v51 }
 0xb95   :  { %2630 = vmatpush3.bf16.msra.mxu0 %v1891_v51 }
 0xb98   :  { %2632 = vmatmul.mubr.msk.bf16.vlgmr.msra.gmra.mrb[48].mxu0 %vm194_vm0, %v3287_v3 }
 0xb99   :  { %2635 = vmatprep.mubr.msk.bf16.mxu0 %vm194_vm0, %v3291_v19 }
 0xba0   :  { %2636 = vmatmul.mubr.msk.bf16.gmra.mrb[52].mxu0 %vm194_vm0, %v3295_v47 }
 0xc6b   :  { %v2633_v54 = vpop.f32.mrb[48].mxu0 }
 0xc6c   :  { %v1942_v55 = vadd.f32 %v2633_v54, %v2142_v53  ;;  %v1933_v56 = vpop.f32.mrb[49].mxu0 }
 0xc6d   :  { %v1934_v57 = vadd.f32 %v2142_v53, %v1933_v56  ;;  %v2634_v58 = vpop.f32.mrb[50].mxu0 }
 0xc6e   :  { %v1966_v59 = vsub.f32 0.0, %v1942_v55  ;;  %v1945_v60 = vadd.f32 %v2634_v58, %v2142_v53  ;;  %v1936_v61 = vpop.f32.mrb[51].mxu0 }
 0xc6f   :  { %v1964_v62 = vsub.f32 0.0, %v1934_v57  ;;  %v1937_v3 = vadd.f32 %v2142_v53, %v1936_v61 }
 0xc70   :  { %v1976_v1 = vmul.f32 1.442695, %v1966_v59  ;;  %v1967_v2 = vsub.f32 0.0, %v1945_v60 }
 0xc71   :  { %v1972_v19 = vmul.f32 1.442695, %v1964_v62  ;;  %v1965_v4 = vsub.f32 0.0, %v1937_v3 }
 0xc72   :  { %2755 = vpow2.f32 %v1976_v1  ;;  %v1978_v47 = vmul.f32 1.442695, %v1967_v2 }
 0xc73   :  { %2757 = vpow2.f32 %v1972_v19  ;;  %v1974_v8 = vmul.f32 1.442695, %v1965_v4  ;;  %v2637_v9 = vpop.f32.mrb[52].mxu0 }
 0xc74   :  { %2759 = vpow2.f32 %v1978_v47  ;;  %v1958_v12 = vadd.f32 %v2637_v9, %v2142_v53  ;;  %v1949_v13 = vpop.f32.mrb[53].mxu0 }
 0xc75   :  { %2761 = vpow2.f32 %v1974_v8  ;;  %v1950_v14 = vadd.f32 %v2142_v53, %v1949_v13  ;;  %v2638_v15 = vpop.f32.mrb[54].mxu0 }
 0xc76   :  { %v1970_v16 = vsub.f32 0.0, %v1958_v12  ;;  %v1961_v17 = vadd.f32 %v2638_v15, %v2142_v53  ;;  %v1952_v18 = vpop.f32.mrb[55].mxu0 }
 0xc77   :  { %v1968_v21 = vsub.f32 0.0, %v1950_v14  ;;  %v1953_v22 = vadd.f32 %v2142_v53, %v1952_v18 }
 0xc78   :  { %v1984_v23 = vmul.f32 1.442695, %v1970_v16  ;;  %v1971_v26 = vsub.f32 0.0, %v1961_v17 }
 0xc79   :  { %v1980_v27 = vmul.f32 1.442695, %v1968_v21  ;;  %v1969_v30 = vsub.f32 0.0, %v1953_v22 }
 0xc7a   :  { %2763 = vpow2.f32 %v1984_v23  ;;  %v1986_v31 = vmul.f32 1.442695, %v1971_v26 }
 0xc7b   :  { %2765 = vpow2.f32 %v1980_v27  ;;  %v1982_v32 = vmul.f32 1.442695, %v1969_v30 }
 0xc7c   :  { %v2756_v33 = vpop.eup %2755  ;;  %2767 = vpow2.f32 %v1986_v31 }
 0xc7d   :  { %v2758_v0 = vpop.eup %2757  ;;  %v1990_v11 = vadd.f32 1.0, %v2756_v33  ;;  %2769 = vpow2.f32 %v1982_v32 }
 0xc7e   :  { %v2760_v29 = vpop.eup %2759  ;;  %v1988_v34 = vadd.f32 1.0, %v2758_v0 }
 0xc7f   :  { %v2762_v35 = vpop.eup %2761  ;;  %2771 = vrcp.f32 %v1990_v11  ;;  %v1991_v36 = vadd.f32 1.0, %v2760_v29 }
 0xc80   :  { %2773 = vrcp.f32 %v1988_v34  ;;  %v1989_v37 = vadd.f32 1.0, %v2762_v35 }
 0xc81   :  { %2775 = vrcp.f32 %v1991_v36 }
 0xc82   :  { %2777 = vrcp.f32 %v1989_v37 }
 0xc84   :  { %v2764_v38 = vpop.eup %2763 }
 0xc85   :  { %v2766_v39 = vpop.eup %2765  ;;  %v1994_v40 = vadd.f32 1.0, %v2764_v38 }
 0xc86   :  { %v2768_v41 = vpop.eup %2767  ;;  %v1992_v63 = vadd.f32 1.0, %v2766_v39 }
 0xc87   :  { %v2770_v10 = vpop.eup %2769  ;;  %2779 = vrcp.f32 %v1994_v40  ;;  %v1995_v44 = vadd.f32 1.0, %v2768_v41 }
 0xc88   :  { %2781 = vrcp.f32 %v1992_v63  ;;  %v1993_v25 = vadd.f32 1.0, %v2770_v10 }
 0xc89   :  { %v2772_v24 = vpop.eup %2771  ;;  %2783 = vrcp.f32 %v1995_v44 }
 0xc8a   :  { %v2774_v20 = vpop.eup %2773  ;;  %2006 = vst [vmem:[#allocation14 + $0x10] sm:$0xff] %v2772_v24  ;;  %2785 = vrcp.f32 %v1993_v25 }
 0xc8b   :  { %v2776_v28 = vpop.eup %2775  ;;  %2004 = vst [vmem:[#allocation14] sm:$0xff] %v2774_v20 }
 0xc8c   :  { %v2778_v43 = vpop.eup %2777  ;;  %2007 = vst [vmem:[#allocation14 + $0x18] sm:$0xff] %v2776_v28 }
 0xc8d   :  { %2005 = vst [vmem:[#allocation14 + $0x8] sm:$0xff] %v2778_v43 }
 0xc91   :  { %v2780_v45 = vpop.eup %2779 }
 0xc92   :  { %v2782_v42 = vpop.eup %2781  ;;  %2010 = vst [vmem:[#allocation14 + $0x30] sm:$0xff] %v2780_v45 }
 0xc93   :  { %v2784_v46 = vpop.eup %2783  ;;  %2008 = vst [vmem:[#allocation14 + $0x20] sm:$0xff] %v2782_v42 }
 0xc94   :  { %v2786_v48 = vpop.eup %2785  ;;  %2011 = vst [vmem:[#allocation14 + $0x38] sm:$0xff] %v2784_v46 }
 0xc95   :  { %2009 = vst [vmem:[#allocation14 + $0x28] sm:$0xff] %v2786_v48 }
 0xc96   :  { %2956 = shalt.err (!%p2953_p4)
}
 0xc97   :  { %s2957_s23 = scalar_lea.hbm %s3339_s9, 1024 }
 0xc98   :  { %p2958_p5 = scmp.ne.s32.totalorder %s3339_s9, %s2957_s23  ;;  %p2961_p6 = scmp.lt.u32.totalorder %s2957_s23, %s3339_s9 }
 0xc9a   :  { %p2963_p7 = pnand %p2961_p6, %p2958_p5 }
 0xc9c   :  { %2966 = shalt.err (!%p2963_p7)
}
 0xc9d   :  { %2023 = dma.vmem_to_hbm [thread:$0]  %s2018_s15, 1024, %s3339_s9, [#allocation4], %s2986_s4, %s2986_s4, %s2987_s21  }
 0xc9e   :  { %2975 = dma.done.wait [#allocation4], 1024  }
 0xc9f   :  { %2976 = vsyncadd [#allocation4], 4294966272 }
 0xca0   :  { %2027 = vsyncpa [#allocation3], 1 }
 0xca1   :  { %2028 = vsyncpa [#allocation6], 1 }
 0xca2   :  { %2029 = vsyncpa [#allocation9], 1 }
 0xca3   :  { %2030 = vsyncpa [#allocation12], 1 }
 0xca4   :  { %2031 = vsyncpa [#allocation4], 1 }

</bundles_post_ra>
